<compile_context>
chip_gen: v7x
topology: tpu7x:2x2x1
jax: 0.10.0
libtpu: 0.0.40
codegen_flags: <defaults>
</compile_context>

<pallas_src>
import functools

import numpy as np
import jax
import jax.numpy as jnp
from jax import lax
from jax.experimental import pallas as pl
from jax.experimental.pallas import tpu as pltpu


def _conv_l2m_kernel(p_ref, w_ref, o_ref):
    """One (batch, channel-tile) grid step.

    p_ref: (1, K10, S_out)  upsampled im2col patches + ones row (K10 = C_in*9+1, S_out = 32*32)
    w_ref: (TM, K10)        conv-weight tile with bias column appended (native PyTorch layout)
    o_ref: (1, TM, S_out)   output tile, NCHW with spatial flattened
    """
    # conv3x3 + bias + nearest-upsample for this channel tile == one MXU matmul.
    o_ref[0] = jnp.dot(w_ref[...], p_ref[0],
                       preferred_element_type=jnp.float32).astype(o_ref.dtype)


def _pick_tile(m):
    """Channel-tile width.  VMEM is never the constraint here (<4 MiB total), so
    pick for MXU M-occupancy and minimum grid-step count: a single full-width
    tile when M <= 512, else the largest lane-dense divisor (256 preferred --
    matches the 256-wide MXU on v6e/v7x)."""
    if m <= 512:
        return m
    for tm in (256, 512, 128):
        if m % tm == 0:
            return tm
    return m


def conv_l2m_forward(latent, weight, bias, hidden_width, hidden_depth, out_size=32):
    """latent: (B, C_in, H, W) f32
       weight: (M, C_in, 3, 3) f32 (PyTorch Conv2d convention), M = hidden_width*hidden_depth
       bias:   (M,) f32
       returns {i: (B, hidden_width, out_size, out_size) f32} for i in range(hidden_depth)."""
    B, C, H, W = latent.shape
    M = hidden_width * hidden_depth
    assert weight.shape == (M, C, 3, 3)
    assert bias.shape == (M,)

    K9 = C * 9
    K10 = K9 + 1                       # bias row folded in
    S_out = out_size * out_size

    # --- tiny input-side glue (the latent is by far the smallest tensor) -----
    # im2col patches in the exact (c*9 + ky*3 + kx) order of the flattened
    # PyTorch conv weight, laid out (K9, S): no weight transpose ever.
    x_pad = jnp.pad(latent, ((0, 0), (0, 0), (1, 1), (1, 1)))
    patches = jnp.stack(
        [x_pad[:, :, ky:ky + H, kx:kx + W] for ky in range(3) for kx in range(3)],
        axis=2)                                   # (B, C, 9, H, W)
    patches = patches.reshape(B, K9, H * W)       # (B, K9, S)

    # Fold the nearest-neighbour upsample into the patches: static numpy index
    # map src = floor(dst * in / out) (PyTorch legacy 'nearest' mode).
    dst = np.arange(out_size)
    src_r = (dst * H) // out_size
    src_c = (dst * W) // out_size
    src_flat = (src_r[:, None] * W + src_c[None, :]).reshape(-1)   # (S_out,) static
    patches_up = patches[:, :, src_flat]          # (B, K9, S_out)

    # Fold the bias: ones row on the patches, bias column on the weight.
    p_aug = jnp.concatenate(
        [patches_up, jnp.ones((B, 1, S_out), dtype=patches_up.dtype)], axis=1)  # (B, K10, S_out)
    w_aug = jnp.concatenate(
        [weight.reshape(M, K9), bias.reshape(M, 1)], axis=1)                    # (M, K10)

    TM = _pick_tile(M)
    grid = (B, M // TM)

    out = pl.pallas_call(
        _conv_l2m_kernel,
        out_shape=jax.ShapeDtypeStruct((B, M, S_out), jnp.float32),
        grid_spec=pltpu.PrefetchScalarGridSpec(
            num_scalar_prefetch=0,
            grid=grid,
            in_specs=[
                pl.BlockSpec((1, K10, S_out), lambda b, m: (b, 0, 0)),  # patches: resident per batch item
                pl.BlockSpec((TM, K10), lambda b, m: (m, 0)),           # weight tile (bias folded in)
            ],
            out_specs=pl.BlockSpec((1, TM, S_out), lambda b, m: (b, m, 0)),  # lane-dense stores (1024 lanes)
        ),
        compiler_params=pltpu.CompilerParams(
            dimension_semantics=("parallel", "parallel"),  # batch axis feeds v7x's two TCs
            vmem_limit_bytes=32 * 1024 * 1024,
        ),
    )(p_aug, w_aug)

    # Kernel already emits NCHW (spatial flattened); only a free reshape and
    # contiguous channel slices remain.
    out4 = out.reshape(B, M, out_size, out_size)
    return {i: out4[:, hidden_width * i: hidden_width * (i + 1)]
            for i in range(hidden_depth)}


if __name__ == "__main__":
    # Small shapes consistent with the module.
    batch = 2
    latent_channel = 4
    latent_size = 16
    hidden_width = 32
    hidden_depth = 8           # modulations = 256 -> one full-width channel tile
    out_size = 32
    modulations = hidden_width * hidden_depth

    key = jax.random.PRNGKey(0)
    k_lat, k_w = jax.random.split(key)

    latent = jax.random.normal(
        k_lat, (batch, latent_channel, latent_size, latent_size), dtype=jnp.float32)

    # Conv2d default init: weight ~ U(-1/sqrt(fan_in), 1/sqrt(fan_in)); bias zeroed by the module.
    fan_in = latent_channel * 9
    bound = 1.0 / (fan_in ** 0.5)
    weight = jax.random.uniform(k_w, (modulations, latent_channel, 3, 3),
                                dtype=jnp.float32, minval=-bound, maxval=bound)
    bias = jnp.zeros((modulations,), dtype=jnp.float32)

    fwd = jax.jit(functools.partial(conv_l2m_forward,
                                    hidden_width=hidden_width,
                                    hidden_depth=hidden_depth,
                                    out_size=out_size))
    outputs = fwd(latent, weight, bias)
    jax.block_until_ready(outputs)

    # Plain-JAX reference: conv3x3 (padding=1) + nearest upsample + channel slices.
    ref_conv = lax.conv_general_dilated(
        latent, weight, window_strides=(1, 1), padding=((1, 1), (1, 1)),
        dimension_numbers=("NCHW", "OIHW", "NCHW"),
        precision=lax.Precision.HIGHEST) + bias[None, :, None, None]
    idx = (jnp.arange(out_size) * latent_size) // out_size   # PyTorch 'nearest' index map
    ref_up = ref_conv[:, :, idx, :][:, :, :, idx]

    for i in range(hidden_depth):
        assert outputs[i].shape == (batch, hidden_width, out_size, out_size)
        ref_slice = ref_up[:, hidden_width * i: hidden_width * (i + 1)]
        assert jnp.allclose(outputs[i], ref_slice, atol=1e-4, rtol=1e-4), f"depth {i} mismatch"

    print("KERNEL_OK")
</pallas_src>

<mosaic_0001>
module attributes {stable_mosaic.version = 11 : i64} {
  func.func @_conv_l2m_kernel(%arg0: i32, %arg1: i32, %arg2: memref<1x37x1024xf32, #tpu.memory_space<vmem>>, %arg3: memref<256x37xf32, #tpu.memory_space<vmem>>, %arg4: memref<1x256x1024xf32, #tpu.memory_space<vmem>>) attributes {dimension_semantics = [#tpu.dimension_semantics<parallel>, #tpu.dimension_semantics<parallel>], iteration_bounds = array<i64: 2, 1>, scalar_prefetch = 0 : i64, scratch_operands = 0 : i64, tpu.core_type = #tpu.core_type<tc>, window_params = [{transform_indices = @transform_0, window_bounds = array<i64: 1, 37, 1024>}, {transform_indices = @transform_1, window_bounds = array<i64: 256, 37>}, {transform_indices = @transform_2, window_bounds = array<i64: 1, 256, 1024>}]} {
    %c0 = arith.constant 0 : index
    %c0_0 = arith.constant 0 : index
    %0 = vector.load %arg3[%c0, %c0_0] : memref<256x37xf32, #tpu.memory_space<vmem>>, vector<256x37xf32>
    %c0_1 = arith.constant 0 : index
    %c0_2 = arith.constant 0 : index
    %c0_3 = arith.constant 0 : index
    %1 = vector.load %arg2[%c0_1, %c0_2, %c0_3] : memref<1x37x1024xf32, #tpu.memory_space<vmem>>, vector<1x37x1024xf32>
    %2 = vector.shape_cast %1 : vector<1x37x1024xf32> to vector<37x1024xf32>
    %cst = arith.constant dense<0.000000e+00> : vector<256x1024xf32>
    %3 = tpu.matmul %0, %2, %cst {dimension_numbers = #tpu.dot_dimension_numbers<[1], [0], [0], [1], [0, 0, 1, 1], [], []>} : vector<256x37xf32>, vector<37x1024xf32>, vector<256x1024xf32> -> vector<256x1024xf32>
    %c0_4 = arith.constant 0 : index
    %c0_5 = arith.constant 0 : index
    %c0_6 = arith.constant 0 : index
    %4 = vector.load %arg4[%c0_4, %c0_5, %c0_6] : memref<1x256x1024xf32, #tpu.memory_space<vmem>>, vector<1x256x1024xf32>
    %5 = vector.shape_cast %4 : vector<1x256x1024xf32> to vector<256x1024xf32>
    %6 = vector.shape_cast %3 : vector<256x1024xf32> to vector<1x256x1024xf32>
    tpu.vector_store %arg4[%c0_4, %c0_5, %c0_6], %6 {strides = array<i32>} : memref<1x256x1024xf32, #tpu.memory_space<vmem>>, vector<1x256x1024xf32>,
    return
  }
  func.func @transform_0(%arg0: i32, %arg1: i32) -> (i32, i32, i32) {
    %c0_i32 = arith.constant 0 : i32
    %c0_i32_0 = arith.constant 0 : i32
    %c0_i32_1 = arith.constant 0 : i32
    return %arg0, %c0_i32, %c0_i32_0 : i32, i32, i32
  }
  func.func @transform_1(%arg0: i32, %arg1: i32) -> (i32, i32) {
    %c0_i32 = arith.constant 0 : i32
    %c0_i32_0 = arith.constant 0 : i32
    return %arg1, %c0_i32 : i32, i32
  }
  func.func @transform_2(%arg0: i32, %arg1: i32) -> (i32, i32, i32) {
    %c0_i32 = arith.constant 0 : i32
    %c0_i32_0 = arith.constant 0 : i32
    return %arg0, %arg1, %c0_i32 : i32, i32, i32
  }
}

</mosaic_0001>

<bundles_post_ra>
// kernel: conv_l2m_forward.1
= control target key start
LH: loop header
LB: loop body
LE: loop exit
PB: predicated region body
PF: predicated region fallthrough
CT: control target
= control target key end

     0   :  { %s2017_s9 = smov 0   ;;  %s2019_s10 = smov 0   ;;  %s2906_s0 = inlined_call_operand.vmem [shape: f32[2,37,1024], index: 0, kind: input, shape index: {}]   ;;  %s2907_s1 = inlined_call_operand.vmem [shape: f32[256,37], index: 1, kind: input, shape index: {}]   ;;  %s2908_s2 = inlined_call_operand.vmem [shape: f32[2,256,1024], index: 2, kind: output, shape index: {}]  }
   0x1   :  { %s2021_s11 = smov 0  }
   0x2 LB: > { %s24_s12 = sadd.s32 1, %s1995_s10  ;;  %p1776_p0 = scmp.ge.s32.totalorder %s1999_s11, 1  ;;  %s1999_s11 = sphi %s2021_s11, %s12_s11   ;;  %s1995_s10 = sphi %s2019_s10, %s2910_s10   ;;  %s1991_s9 = sphi %s2017_s9, %s2909_s9  }
   0x3   : > { %p26_p1 = scmp.ge.s32.totalorder %s24_s12, 2  ;;  %p137_p2 = scmp.lt.s32.totalorder %s1999_s11, 3 }
   0x5   : > { %s2912_s12 = smov (%p26_p1, %s24_s12), 0  ;;  %p138_p3 = pnand %p1776_p0, %p137_p2 }
   0x6   : > { %p169_p4 = scmp.lt.s32.totalorder (!%p138_p3), %s1991_s9, 1  ;;  %v2001_v0 = vmov (!%p138_p3), 0.0   ;;  %vm360_vm0 = vcmask (!%p138_p3), 1044480   ;;  %v2078_v37 = vld [vmem:[%s2907_s1] sm:$0xff] (!%p138_p3)  ;;  %vm263_vm1 = vcmask (!%p138_p3), 302080   ;;  %v2095_v48 = vld [vmem:[%s2907_s1 + $0x8] sm:$0xff] (!%p138_p3) }
   0x7   : > { %141 = sbr.rel (%p138_p3) target bundleno = 499 (0x1f3), region = 28  ;;  %449 = vmatprep.mubr.f32.mxu0 (!%p138_p3), %v2001_v0  ;;  %706 = vmatprep.mubr.f32.mxu1 (!%p138_p3), %v2001_v0  ;;  %v2109_v55 = vld [vmem:[%s2907_s1 + $0x10] sm:$0xff] (!%p138_p3)  ;;  %v2123_v59 = vld [vmem:[%s2907_s1 + $0x18] sm:$0xff] (!%p138_p3)  ;;  %v2139_v61 = vld [vmem:[%s2907_s1 + $0x20] sm:$0xff] (!%p138_p3) }
   0x8   : > { %v2150_v62 = vld [vmem:[%s2907_s1 + $0x28] sm:$0xff] (!%p138_p3)  ;;  %v2161_v63 = vld [vmem:[%s2907_s1 + $0x30] sm:$0xff] (!%p138_p3) }
   0xe   : > { %s2914_s9 = smov (!%p169_p4, %s1991_s9), 1 }
   0xf   : > { %s1951_s13 = smul.u32 320, %s2914_s9  ;;  %s1918_s5 = sshll.u32 %s2914_s9, 11 }
  0x10   : > { %s2571_s8 = scalar_lea.vmem %s2908_s2, %s1918_s5 }
  0x11   : > { %s2043_s16 = scalar_lea.vmem %s2906_s0, %s1951_s13 }
  0x12   : > { %v224_v1 = vld [vmem:[%s2043_s16 + $0x8] sm:$0xff]  ;;  %v226_v3 = vld [vmem:[%s2043_s16 + $0x18] sm:$0xff]  ;;  %v223_v6 = vld [vmem:[%s2043_s16] sm:$0xff] }
  0x13   : > { %v232_v2 = vld [vmem:[%s2043_s16 + $0x48] sm:$0xff]  ;;  %v234_v5 = vld [vmem:[%s2043_s16 + $0x58] sm:$0xff]  ;;  %v231_v7 = vld [vmem:[%s2043_s16 + $0x40] sm:$0xff] }
  0x14   : > { %v1919_v4 = vpack.c.bf16 %v232_v2, %v224_v1  ;;  %v1927_v8 = vpack.c.bf16 %v234_v5, %v226_v3  ;;  %v1921_v9 = vpack.c.bf16 %v231_v7, %v223_v6  ;;  %v225_v10 = vld [vmem:[%s2043_s16 + $0x10] sm:$0xff]  ;;  %v240_v12 = vld [vmem:[%s2043_s16 + $0x88] sm:$0xff]  ;;  %v242_v15 = vld [vmem:[%s2043_s16 + $0x98] sm:$0xff] }
  0x15   : > { %v233_v11 = vld [vmem:[%s2043_s16 + $0x50] sm:$0xff]  ;;  %v248_v14 = vld [vmem:[%s2043_s16 + $0xc8] sm:$0xff]  ;;  %v250_v16 = vld [vmem:[%s2043_s16 + $0xd8] sm:$0xff] }
  0x16   : > { %1920 = vmatprep.subr.bf16.mxu0 %v1919_v4  ;;  %v1929_v13 = vpack.c.bf16 %v233_v11, %v225_v10  ;;  %1928 = vmatprep.subr.bf16.mxu1 %v1927_v8  ;;  %v1923_v17 = vpack.c.bf16 %v248_v14, %v240_v12  ;;  %v1931_v18 = vpack.c.bf16 %v250_v16, %v242_v15  ;;  %v239_v19 = vld [vmem:[%s2043_s16 + $0x80] sm:$0xff]  ;;  %v241_v21 = vld [vmem:[%s2043_s16 + $0x90] sm:$0xff]  ;;  %v256_v25 = vld [vmem:[%s2043_s16 + $0x108] sm:$0x1f] }
  0x17   : > { %1922 = vmatpush1.bf16.msra.mxu0 %v1921_v9  ;;  %v247_v20 = vld [vmem:[%s2043_s16 + $0xc0] sm:$0xff]  ;;  %v249_v23 = vld [vmem:[%s2043_s16 + $0xd0] sm:$0xff]  ;;  %v258_v26 = vld [vmem:[%s2043_s16 + $0x118] sm:$0x1f] }
  0x18   : > { %1930 = vmatpush1.bf16.msra.mxu1 %v1929_v13  ;;  %v1925_v22 = vpack.c.bf16 %v247_v20, %v239_v19  ;;  %1924 = vmatprep.subr.bf16.mxu0 %v1923_v17  ;;  %v1933_v24 = vpack.c.bf16 %v249_v23, %v241_v21  ;;  %v228_v27 = vld [vmem:[%s2043_s16 + $0x28] sm:$0xff]  ;;  %v230_v29 = vld [vmem:[%s2043_s16 + $0x38] sm:$0xff]  ;;  %v227_v31 = vld [vmem:[%s2043_s16 + $0x20] sm:$0xff] }
  0x19   : > { %1932 = vmatprep.subr.bf16.mxu1 %v1931_v18  ;;  %v236_v28 = vld [vmem:[%s2043_s16 + $0x68] sm:$0xff]  ;;  %v238_v30 = vld [vmem:[%s2043_s16 + $0x78] sm:$0xff]  ;;  %v235_v32 = vld [vmem:[%s2043_s16 + $0x60] sm:$0xff] }
  0x1a   : > { %v255_v33 = vld [vmem:[%s2043_s16 + $0x100] sm:$0x1f]  ;;  %v229_v34 = vld [vmem:[%s2043_s16 + $0x30] sm:$0xff]  ;;  %v1935_v38 = vpack.c.bf16 %v236_v28, %v228_v27  ;;  %v1943_v39 = vpack.c.bf16 %v238_v30, %v230_v29  ;;  %v1937_v40 = vpack.c.bf16 %v235_v32, %v227_v31  ;;  %v244_v42 = vld [vmem:[%s2043_s16 + $0xa8] sm:$0xff] }
  0x1b   : > { %1926 = vmatpush1.bf16.msra.mxu0 %v1925_v22  ;;  %v237_v35 = vld [vmem:[%s2043_s16 + $0x70] sm:$0xff]  ;;  %v252_v43 = vld [vmem:[%s2043_s16 + $0xe8] sm:$0xff]  ;;  %v246_v44 = vld [vmem:[%s2043_s16 + $0xb8] sm:$0xff] }
  0x1c   : > { %1934 = vmatpush1.bf16.msra.mxu1 %v1933_v24  ;;  %1780 = vmatprep.subr.msk.mxu0 %vm360_vm0, %v256_v25  ;;  %v257_v36 = vld [vmem:[%s2043_s16 + $0x110] sm:$0x1f]  ;;  %v1945_v41 = vpack.c.bf16 %v237_v35, %v229_v34  ;;  %v254_v45 = vld [vmem:[%s2043_s16 + $0xf8] sm:$0xff]  ;;  %v243_v46 = vld [vmem:[%s2043_s16 + $0xa0] sm:$0xff]  ;;  %v1939_v51 = vpack.c.bf16 %v252_v43, %v244_v42 }
  0x1d   : > { %1814 = vmatprep.subr.msk.mxu1 %vm360_vm0, %v258_v26  ;;  %v251_v47 = vld [vmem:[%s2043_s16 + $0xe0] sm:$0xff]  ;;  %v245_v49 = vld [vmem:[%s2043_s16 + $0xb0] sm:$0xff]  ;;  %v1947_v52 = vpack.c.bf16 %v254_v45, %v246_v44  ;;  %v260_v56 = vld [vmem:[%s2043_s16 + $0x128] sm:$0x1f] }
  0x1e   : > { %v253_v50 = vld [vmem:[%s2043_s16 + $0xf0] sm:$0xff]  ;;  %v1941_v53 = vpack.c.bf16 %v251_v47, %v243_v46  ;;  %v262_v57 = vld [vmem:[%s2043_s16 + $0x138] sm:$0x1f]  ;;  %v259_v58 = vld [vmem:[%s2043_s16 + $0x120] sm:$0x1f] }
  0x1f   : > { %1781 = vmatpush1.msk.msra.mxu0 %vm360_vm0, %v255_v33  ;;  %v1949_v54 = vpack.c.bf16 %v253_v50, %v245_v49  ;;  %v261_v60 = vld [vmem:[%s2043_s16 + $0x130] sm:$0x1f]  ;;  %v2172_v1 = vld [vmem:[%s2907_s1 + $0x38] sm:$0xff]  ;;  %v2183_v2 = vld [vmem:[%s2907_s1 + $0x40] sm:$0xff] }
  0x20   : > { %1815 = vmatpush1.msk.msra.mxu1 %vm360_vm0, %v257_v36  ;;  %1782 = vmatmul.mubr.msk.f32.vlgmr.msra.gmra.mrb[0].mxu0 %vm263_vm1, %v2078_v37  ;;  %v2194_v3 = vld [vmem:[%s2907_s1 + $0x48] sm:$0xff]  ;;  %v2205_v4 = vld [vmem:[%s2907_s1 + $0x50] sm:$0xff]  ;;  %v2216_v5 = vld [vmem:[%s2907_s1 + $0x58] sm:$0xff] }
  0x21   : > { %1816 = vmatmul.mubr.msk.f32.vlgmr.msra.gmra.mrb[0].mxu1 %vm263_vm1, %v2078_v37  ;;  %1936 = vmatprep.subr.bf16.mxu0 %v1935_v38  ;;  %v2227_v6 = vld [vmem:[%s2907_s1 + $0x60] sm:$0xff]  ;;  %v2238_v7 = vld [vmem:[%s2907_s1 + $0x68] sm:$0xff]  ;;  %v2249_v8 = vld [vmem:[%s2907_s1 + $0x70] sm:$0xff] }
  0x22   : > { %1944 = vmatprep.subr.bf16.mxu1 %v1943_v39  ;;  %1938 = vmatpush1.bf16.msra.mxu0 %v1937_v40  ;;  %v2260_v9 = vld [vmem:[%s2907_s1 + $0x78] sm:$0xff]  ;;  %v2271_v10 = vld [vmem:[%s2907_s1 + $0x80] sm:$0xff]  ;;  %v2282_v11 = vld [vmem:[%s2907_s1 + $0x88] sm:$0xff] }
  0x23   : > { %1946 = vmatpush1.bf16.msra.mxu1 %v1945_v41  ;;  %455 = vmatprep.mubr.f32.mxu0 %v2001_v0  ;;  %v2293_v12 = vld [vmem:[%s2907_s1 + $0x90] sm:$0xff]  ;;  %v2304_v13 = vld [vmem:[%s2907_s1 + $0x98] sm:$0xff]  ;;  %v2315_v14 = vld [vmem:[%s2907_s1 + $0xa0] sm:$0xff] }
  0x24   : > { %712 = vmatprep.mubr.f32.mxu1 %v2001_v0  ;;  %1783 = vmatmul.mubr.msk.f32.gmra.mrb[2].mxu0 %vm263_vm1, %v2095_v48  ;;  %v2326_v15 = vld [vmem:[%s2907_s1 + $0xa8] sm:$0xff]  ;;  %v2337_v16 = vld [vmem:[%s2907_s1 + $0xb0] sm:$0xff]  ;;  %v2348_v17 = vld [vmem:[%s2907_s1 + $0xb8] sm:$0xff] }
  0x25   : > { %1817 = vmatmul.mubr.msk.f32.gmra.mrb[2].mxu1 %vm263_vm1, %v2095_v48  ;;  %461 = vmatprep.mubr.f32.mxu0 %v2001_v0  ;;  %v2359_v18 = vld [vmem:[%s2907_s1 + $0xc0] sm:$0xff]  ;;  %v2370_v19 = vld [vmem:[%s2907_s1 + $0xc8] sm:$0xff]  ;;  %v2381_v20 = vld [vmem:[%s2907_s1 + $0xd0] sm:$0xff] }
  0x26   : > { %718 = vmatprep.mubr.f32.mxu1 %v2001_v0  ;;  %1940 = vmatprep.subr.bf16.mxu0 %v1939_v51  ;;  %v2392_v21 = vld [vmem:[%s2907_s1 + $0xd8] sm:$0xff]  ;;  %v2403_v22 = vld [vmem:[%s2907_s1 + $0xe0] sm:$0xff]  ;;  %v2414_v23 = vld [vmem:[%s2907_s1 + $0xe8] sm:$0xff] }
  0x27   : > { %1948 = vmatprep.subr.bf16.mxu1 %v1947_v52  ;;  %1942 = vmatpush1.bf16.msra.mxu0 %v1941_v53  ;;  %v2425_v24 = vld [vmem:[%s2907_s1 + $0xf0] sm:$0xff]  ;;  %v2436_v25 = vld [vmem:[%s2907_s1 + $0xf8] sm:$0xff] }
  0x28   : > { %1784 = vmatmul.mubr.msk.f32.gmra.mrb[4].mxu0 %vm263_vm1, %v2109_v55  ;;  %1950 = vmatpush1.bf16.msra.mxu1 %v1949_v54 }
  0x29   : > { %1818 = vmatmul.mubr.msk.f32.gmra.mrb[4].mxu1 %vm263_vm1, %v2109_v55  ;;  %467 = vmatprep.mubr.f32.mxu0 %v2001_v0 }
  0x2a   : > { %724 = vmatprep.mubr.f32.mxu1 %v2001_v0  ;;  %1848 = vmatprep.subr.msk.mxu0 %vm360_vm0, %v260_v56 }
  0x2b   : > { %1882 = vmatprep.subr.msk.mxu1 %vm360_vm0, %v262_v57  ;;  %1849 = vmatpush1.msk.msra.mxu0 %vm360_vm0, %v259_v58 }
  0x2c   : > { %1785 = vmatmul.mubr.msk.f32.gmra.mrb[6].mxu0 %vm263_vm1, %v2123_v59  ;;  %1883 = vmatpush1.msk.msra.mxu1 %vm360_vm0, %v261_v60 }
  0x2d   : > { %1819 = vmatmul.mubr.msk.f32.gmra.mrb[6].mxu1 %vm263_vm1, %v2123_v59  ;;  %473 = vmatprep.mubr.f32.mxu0 %v2001_v0 }
  0x2e   : > { %730 = vmatprep.mubr.f32.mxu1 %v2001_v0 }
  0x30   : > { %1786 = vmatmul.mubr.msk.f32.gmra.mrb[8].mxu0 %vm263_vm1, %v2139_v61 }
  0x31   : > { %1820 = vmatmul.mubr.msk.f32.gmra.mrb[8].mxu1 %vm263_vm1, %v2139_v61  ;;  %479 = vmatprep.mubr.f32.mxu0 %v2001_v0 }
  0x32   : > { %736 = vmatprep.mubr.f32.mxu1 %v2001_v0 }
  0x34   : > { %1787 = vmatmul.mubr.msk.f32.gmra.mrb[10].mxu0 %vm263_vm1, %v2150_v62 }
  0x35   : > { %1821 = vmatmul.mubr.msk.f32.gmra.mrb[10].mxu1 %vm263_vm1, %v2150_v62  ;;  %485 = vmatprep.mubr.f32.mxu0 %v2001_v0 }
  0x36   : > { %742 = vmatprep.mubr.f32.mxu1 %v2001_v0 }
  0x38   : > { %1788 = vmatmul.mubr.msk.f32.gmra.mrb[12].mxu0 %vm263_vm1, %v2161_v63 }
  0x39   : > { %1822 = vmatmul.mubr.msk.f32.gmra.mrb[12].mxu1 %vm263_vm1, %v2161_v63  ;;  %491 = vmatprep.mubr.f32.mxu0 %v2001_v0 }
  0x3a   : > { %748 = vmatprep.mubr.f32.mxu1 %v2001_v0 }
  0x3c   : > { %1789 = vmatmul.mubr.msk.f32.gmra.mrb[14].mxu0 %vm263_vm1, %v2172_v1 }
  0x3d   : > { %1823 = vmatmul.mubr.msk.f32.gmra.mrb[14].mxu1 %vm263_vm1, %v2172_v1  ;;  %497 = vmatprep.mubr.f32.mxu0 %v2001_v0 }
  0x3e   : > { %754 = vmatprep.mubr.f32.mxu1 %v2001_v0 }
  0x40   : > { %1790 = vmatmul.mubr.msk.f32.gmra.mrb[16].mxu0 %vm263_vm1, %v2183_v2 }
  0x41   : > { %1824 = vmatmul.mubr.msk.f32.gmra.mrb[16].mxu1 %vm263_vm1, %v2183_v2  ;;  %503 = vmatprep.mubr.f32.mxu0 %v2001_v0 }
  0x42   : > { %760 = vmatprep.mubr.f32.mxu1 %v2001_v0 }
  0x44   : > { %1791 = vmatmul.mubr.msk.f32.gmra.mrb[18].mxu0 %vm263_vm1, %v2194_v3 }
  0x45   : > { %1825 = vmatmul.mubr.msk.f32.gmra.mrb[18].mxu1 %vm263_vm1, %v2194_v3  ;;  %509 = vmatprep.mubr.f32.mxu0 %v2001_v0 }
  0x46   : > { %766 = vmatprep.mubr.f32.mxu1 %v2001_v0 }
  0x48   : > { %1792 = vmatmul.mubr.msk.f32.gmra.mrb[20].mxu0 %vm263_vm1, %v2205_v4 }
  0x49   : > { %1826 = vmatmul.mubr.msk.f32.gmra.mrb[20].mxu1 %vm263_vm1, %v2205_v4  ;;  %515 = vmatprep.mubr.f32.mxu0 %v2001_v0 }
  0x4a   : > { %772 = vmatprep.mubr.f32.mxu1 %v2001_v0 }
  0x4c   : > { %1793 = vmatmul.mubr.msk.f32.gmra.mrb[22].mxu0 %vm263_vm1, %v2216_v5 }
  0x4d   : > { %1827 = vmatmul.mubr.msk.f32.gmra.mrb[22].mxu1 %vm263_vm1, %v2216_v5  ;;  %521 = vmatprep.mubr.f32.mxu0 %v2001_v0 }
  0x4e   : > { %778 = vmatprep.mubr.f32.mxu1 %v2001_v0 }
  0x50   : > { %1794 = vmatmul.mubr.msk.f32.gmra.mrb[24].mxu0 %vm263_vm1, %v2227_v6 }
  0x51   : > { %1828 = vmatmul.mubr.msk.f32.gmra.mrb[24].mxu1 %vm263_vm1, %v2227_v6  ;;  %527 = vmatprep.mubr.f32.mxu0 %v2001_v0 }
  0x52   : > { %784 = vmatprep.mubr.f32.mxu1 %v2001_v0 }
  0x54   : > { %1795 = vmatmul.mubr.msk.f32.gmra.mrb[26].mxu0 %vm263_vm1, %v2238_v7 }
  0x55   : > { %1829 = vmatmul.mubr.msk.f32.gmra.mrb[26].mxu1 %vm263_vm1, %v2238_v7  ;;  %533 = vmatprep.mubr.f32.mxu0 %v2001_v0 }
  0x56   : > { %790 = vmatprep.mubr.f32.mxu1 %v2001_v0 }
  0x58   : > { %1796 = vmatmul.mubr.msk.f32.gmra.mrb[28].mxu0 %vm263_vm1, %v2249_v8 }
  0x59   : > { %1830 = vmatmul.mubr.msk.f32.gmra.mrb[28].mxu1 %vm263_vm1, %v2249_v8  ;;  %539 = vmatprep.mubr.f32.mxu0 %v2001_v0 }
  0x5a   : > { %796 = vmatprep.mubr.f32.mxu1 %v2001_v0 }
  0x5c   : > { %1797 = vmatmul.mubr.msk.f32.gmra.mrb[30].mxu0 %vm263_vm1, %v2260_v9 }
  0x5d   : > { %1831 = vmatmul.mubr.msk.f32.gmra.mrb[30].mxu1 %vm263_vm1, %v2260_v9  ;;  %545 = vmatprep.mubr.f32.mxu0 %v2001_v0 }
  0x5e   : > { %802 = vmatprep.mubr.f32.mxu1 %v2001_v0 }
  0x60   : > { %1798 = vmatmul.mubr.msk.f32.gmra.mrb[32].mxu0 %vm263_vm1, %v2271_v10 }
  0x61   : > { %1832 = vmatmul.mubr.msk.f32.gmra.mrb[32].mxu1 %vm263_vm1, %v2271_v10  ;;  %551 = vmatprep.mubr.f32.mxu0 %v2001_v0 }
  0x62   : > { %808 = vmatprep.mubr.f32.mxu1 %v2001_v0 }
  0x64   : > { %1799 = vmatmul.mubr.msk.f32.gmra.mrb[34].mxu0 %vm263_vm1, %v2282_v11 }
  0x65   : > { %1833 = vmatmul.mubr.msk.f32.gmra.mrb[34].mxu1 %vm263_vm1, %v2282_v11  ;;  %557 = vmatprep.mubr.f32.mxu0 %v2001_v0 }
  0x66   : > { %814 = vmatprep.mubr.f32.mxu1 %v2001_v0 }
  0x68   : > { %1800 = vmatmul.mubr.msk.f32.gmra.mrb[36].mxu0 %vm263_vm1, %v2293_v12 }
  0x69   : > { %1834 = vmatmul.mubr.msk.f32.gmra.mrb[36].mxu1 %vm263_vm1, %v2293_v12  ;;  %563 = vmatprep.mubr.f32.mxu0 %v2001_v0 }
  0x6a   : > { %820 = vmatprep.mubr.f32.mxu1 %v2001_v0 }
  0x6c   : > { %1801 = vmatmul.mubr.msk.f32.gmra.mrb[38].mxu0 %vm263_vm1, %v2304_v13 }
  0x6d   : > { %1835 = vmatmul.mubr.msk.f32.gmra.mrb[38].mxu1 %vm263_vm1, %v2304_v13  ;;  %569 = vmatprep.mubr.f32.mxu0 %v2001_v0 }
  0x6e   : > { %826 = vmatprep.mubr.f32.mxu1 %v2001_v0 }
  0x70   : > { %1802 = vmatmul.mubr.msk.f32.gmra.mrb[40].mxu0 %vm263_vm1, %v2315_v14 }
  0x71   : > { %1836 = vmatmul.mubr.msk.f32.gmra.mrb[40].mxu1 %vm263_vm1, %v2315_v14  ;;  %575 = vmatprep.mubr.f32.mxu0 %v2001_v0 }
  0x72   : > { %832 = vmatprep.mubr.f32.mxu1 %v2001_v0 }
  0x74   : > { %1803 = vmatmul.mubr.msk.f32.gmra.mrb[42].mxu0 %vm263_vm1, %v2326_v15 }
  0x75   : > { %1837 = vmatmul.mubr.msk.f32.gmra.mrb[42].mxu1 %vm263_vm1, %v2326_v15  ;;  %581 = vmatprep.mubr.f32.mxu0 %v2001_v0 }
  0x76   : > { %838 = vmatprep.mubr.f32.mxu1 %v2001_v0 }
  0x78   : > { %1804 = vmatmul.mubr.msk.f32.gmra.mrb[44].mxu0 %vm263_vm1, %v2337_v16 }
  0x79   : > { %1838 = vmatmul.mubr.msk.f32.gmra.mrb[44].mxu1 %vm263_vm1, %v2337_v16  ;;  %587 = vmatprep.mubr.f32.mxu0 %v2001_v0 }
  0x7a   : > { %844 = vmatprep.mubr.f32.mxu1 %v2001_v0 }
  0x7c   : > { %1805 = vmatmul.mubr.msk.f32.gmra.mrb[46].mxu0 %vm263_vm1, %v2348_v17 }
  0x7d   : > { %1839 = vmatmul.mubr.msk.f32.gmra.mrb[46].mxu1 %vm263_vm1, %v2348_v17  ;;  %593 = vmatprep.mubr.f32.mxu0 %v2001_v0 }
  0x7e   : > { %850 = vmatprep.mubr.f32.mxu1 %v2001_v0 }
  0x80   : > { %1806 = vmatmul.mubr.msk.f32.gmra.mrb[48].mxu0 %vm263_vm1, %v2359_v18 }
  0x81   : > { %1840 = vmatmul.mubr.msk.f32.gmra.mrb[48].mxu1 %vm263_vm1, %v2359_v18  ;;  %599 = vmatprep.mubr.f32.mxu0 %v2001_v0 }
  0x82   : > { %856 = vmatprep.mubr.f32.mxu1 %v2001_v0 }
  0x84   : > { %1807 = vmatmul.mubr.msk.f32.gmra.mrb[50].mxu0 %vm263_vm1, %v2370_v19 }
  0x85   : > { %1841 = vmatmul.mubr.msk.f32.gmra.mrb[50].mxu1 %vm263_vm1, %v2370_v19  ;;  %605 = vmatprep.mubr.f32.mxu0 %v2001_v0 }
  0x86   : > { %862 = vmatprep.mubr.f32.mxu1 %v2001_v0 }
  0x88   : > { %1808 = vmatmul.mubr.msk.f32.gmra.mrb[52].mxu0 %vm263_vm1, %v2381_v20 }
  0x89   : > { %1842 = vmatmul.mubr.msk.f32.gmra.mrb[52].mxu1 %vm263_vm1, %v2381_v20  ;;  %611 = vmatprep.mubr.f32.mxu0 %v2001_v0 }
  0x8a   : > { %868 = vmatprep.mubr.f32.mxu1 %v2001_v0 }
  0x8c   : > { %1809 = vmatmul.mubr.msk.f32.gmra.mrb[54].mxu0 %vm263_vm1, %v2392_v21 }
  0x8d   : > { %1843 = vmatmul.mubr.msk.f32.gmra.mrb[54].mxu1 %vm263_vm1, %v2392_v21  ;;  %617 = vmatprep.mubr.f32.mxu0 %v2001_v0 }
  0x8e   : > { %874 = vmatprep.mubr.f32.mxu1 %v2001_v0 }
  0x90   : > { %1810 = vmatmul.mubr.msk.f32.gmra.mrb[56].mxu0 %vm263_vm1, %v2403_v22 }
  0x91   : > { %1844 = vmatmul.mubr.msk.f32.gmra.mrb[56].mxu1 %vm263_vm1, %v2403_v22  ;;  %623 = vmatprep.mubr.f32.mxu0 %v2001_v0 }
  0x92   : > { %880 = vmatprep.mubr.f32.mxu1 %v2001_v0 }
  0x94   : > { %1811 = vmatmul.mubr.msk.f32.gmra.mrb[58].mxu0 %vm263_vm1, %v2414_v23 }
  0x95   : > { %1845 = vmatmul.mubr.msk.f32.gmra.mrb[58].mxu1 %vm263_vm1, %v2414_v23  ;;  %629 = vmatprep.mubr.f32.mxu0 %v2001_v0 }
  0x96   : > { %886 = vmatprep.mubr.f32.mxu1 %v2001_v0 }
  0x98   : > { %1812 = vmatmul.mubr.msk.f32.gmra.mrb[60].mxu0 %vm263_vm1, %v2425_v24 }
  0x99   : > { %1846 = vmatmul.mubr.msk.f32.gmra.mrb[60].mxu1 %vm263_vm1, %v2425_v24  ;;  %635 = vmatprep.mubr.f32.mxu0 %v2001_v0 }
  0x9a   : > { %892 = vmatprep.mubr.f32.mxu1 %v2001_v0 }
  0x9c   : > { %1813 = vmatmul.mubr.msk.f32.gmra.mrb[62].mxu0 %vm263_vm1, %v2436_v25 }
  0x9d   : > { %1847 = vmatmul.mubr.msk.f32.gmra.mrb[62].mxu1 %vm263_vm1, %v2436_v25  ;;  %963 = vmatprep.mubr.f32.mxu0 %v2001_v0 }
  0x9e   : > { %1220 = vmatprep.mubr.f32.mxu1 %v2001_v0 }
  0xa0   : > { %1850 = vmatmul.mubr.msk.f32.vlgmr.msra.gmra.mrb[64].mxu0 %vm263_vm1, %v2078_v37 }
  0xa1   : > { %1884 = vmatmul.mubr.msk.f32.vlgmr.msra.gmra.mrb[64].mxu1 %vm263_vm1, %v2078_v37  ;;  %969 = vmatprep.mubr.f32.mxu0 %v2001_v0 }
  0xa2   : > { %1226 = vmatprep.mubr.f32.mxu1 %v2001_v0 }
  0xa4   : > { %1851 = vmatmul.mubr.msk.f32.gmra.mrb[66].mxu0 %vm263_vm1, %v2095_v48 }
  0xa5   : > { %1885 = vmatmul.mubr.msk.f32.gmra.mrb[66].mxu1 %vm263_vm1, %v2095_v48  ;;  %975 = vmatprep.mubr.f32.mxu0 %v2001_v0 }
  0xa6   : > { %1232 = vmatprep.mubr.f32.mxu1 %v2001_v0 }
  0xa8   : > { %1852 = vmatmul.mubr.msk.f32.gmra.mrb[68].mxu0 %vm263_vm1, %v2109_v55 }
  0xa9   : > { %1886 = vmatmul.mubr.msk.f32.gmra.mrb[68].mxu1 %vm263_vm1, %v2109_v55  ;;  %981 = vmatprep.mubr.f32.mxu0 %v2001_v0 }
  0xaa   : > { %1238 = vmatprep.mubr.f32.mxu1 %v2001_v0 }
  0xac   : > { %1853 = vmatmul.mubr.msk.f32.gmra.mrb[70].mxu0 %vm263_vm1, %v2123_v59 }
  0xad   : > { %1887 = vmatmul.mubr.msk.f32.gmra.mrb[70].mxu1 %vm263_vm1, %v2123_v59  ;;  %987 = vmatprep.mubr.f32.mxu0 %v2001_v0 }
  0xae   : > { %1244 = vmatprep.mubr.f32.mxu1 %v2001_v0 }
  0xb0   : > { %1854 = vmatmul.mubr.msk.f32.gmra.mrb[72].mxu0 %vm263_vm1, %v2139_v61 }
  0xb1   : > { %1888 = vmatmul.mubr.msk.f32.gmra.mrb[72].mxu1 %vm263_vm1, %v2139_v61  ;;  %993 = vmatprep.mubr.f32.mxu0 %v2001_v0 }
  0xb2   : > { %1250 = vmatprep.mubr.f32.mxu1 %v2001_v0 }
  0xb4   : > { %1855 = vmatmul.mubr.msk.f32.gmra.mrb[74].mxu0 %vm263_vm1, %v2150_v62 }
  0xb5   : > { %1889 = vmatmul.mubr.msk.f32.gmra.mrb[74].mxu1 %vm263_vm1, %v2150_v62  ;;  %999 = vmatprep.mubr.f32.mxu0 %v2001_v0 }
  0xb6   : > { %1256 = vmatprep.mubr.f32.mxu1 %v2001_v0 }
  0xb8   : > { %1856 = vmatmul.mubr.msk.f32.gmra.mrb[76].mxu0 %vm263_vm1, %v2161_v63 }
  0xb9   : > { %1890 = vmatmul.mubr.msk.f32.gmra.mrb[76].mxu1 %vm263_vm1, %v2161_v63  ;;  %1005 = vmatprep.mubr.f32.mxu0 %v2001_v0 }
  0xba   : > { %1262 = vmatprep.mubr.f32.mxu1 %v2001_v0 }
  0xbc   : > { %1857 = vmatmul.mubr.msk.f32.gmra.mrb[78].mxu0 %vm263_vm1, %v2172_v1 }
  0xbd   : > { %1891 = vmatmul.mubr.msk.f32.gmra.mrb[78].mxu1 %vm263_vm1, %v2172_v1  ;;  %1011 = vmatprep.mubr.f32.mxu0 %v2001_v0 }
  0xbe   : > { %1268 = vmatprep.mubr.f32.mxu1 %v2001_v0 }
  0xc0   : > { %1858 = vmatmul.mubr.msk.f32.gmra.mrb[80].mxu0 %vm263_vm1, %v2183_v2 }
  0xc1   : > { %1892 = vmatmul.mubr.msk.f32.gmra.mrb[80].mxu1 %vm263_vm1, %v2183_v2  ;;  %1017 = vmatprep.mubr.f32.mxu0 %v2001_v0 }
  0xc2   : > { %1274 = vmatprep.mubr.f32.mxu1 %v2001_v0 }
  0xc4   : > { %1859 = vmatmul.mubr.msk.f32.gmra.mrb[82].mxu0 %vm263_vm1, %v2194_v3 }
  0xc5   : > { %1893 = vmatmul.mubr.msk.f32.gmra.mrb[82].mxu1 %vm263_vm1, %v2194_v3  ;;  %1023 = vmatprep.mubr.f32.mxu0 %v2001_v0 }
  0xc6   : > { %1280 = vmatprep.mubr.f32.mxu1 %v2001_v0 }
  0xc8   : > { %1860 = vmatmul.mubr.msk.f32.gmra.mrb[84].mxu0 %vm263_vm1, %v2205_v4 }
  0xc9   : > { %1894 = vmatmul.mubr.msk.f32.gmra.mrb[84].mxu1 %vm263_vm1, %v2205_v4  ;;  %1029 = vmatprep.mubr.f32.mxu0 %v2001_v0 }
  0xca   : > { %1286 = vmatprep.mubr.f32.mxu1 %v2001_v0 }
  0xcc   : > { %1861 = vmatmul.mubr.msk.f32.gmra.mrb[86].mxu0 %vm263_vm1, %v2216_v5 }
  0xcd   : > { %1895 = vmatmul.mubr.msk.f32.gmra.mrb[86].mxu1 %vm263_vm1, %v2216_v5  ;;  %1035 = vmatprep.mubr.f32.mxu0 %v2001_v0 }
  0xce   : > { %1292 = vmatprep.mubr.f32.mxu1 %v2001_v0 }
  0xd0   : > { %1862 = vmatmul.mubr.msk.f32.gmra.mrb[88].mxu0 %vm263_vm1, %v2227_v6 }
  0xd1   : > { %1896 = vmatmul.mubr.msk.f32.gmra.mrb[88].mxu1 %vm263_vm1, %v2227_v6  ;;  %1041 = vmatprep.mubr.f32.mxu0 %v2001_v0 }
  0xd2   : > { %1298 = vmatprep.mubr.f32.mxu1 %v2001_v0 }
  0xd4   : > { %1863 = vmatmul.mubr.msk.f32.gmra.mrb[90].mxu0 %vm263_vm1, %v2238_v7 }
  0xd5   : > { %1897 = vmatmul.mubr.msk.f32.gmra.mrb[90].mxu1 %vm263_vm1, %v2238_v7  ;;  %1047 = vmatprep.mubr.f32.mxu0 %v2001_v0 }
  0xd6   : > { %1304 = vmatprep.mubr.f32.mxu1 %v2001_v0 }
  0xd8   : > { %1864 = vmatmul.mubr.msk.f32.gmra.mrb[92].mxu0 %vm263_vm1, %v2249_v8 }
  0xd9   : > { %1898 = vmatmul.mubr.msk.f32.gmra.mrb[92].mxu1 %vm263_vm1, %v2249_v8  ;;  %1053 = vmatprep.mubr.f32.mxu0 %v2001_v0 }
  0xda   : > { %1310 = vmatprep.mubr.f32.mxu1 %v2001_v0 }
  0xdc   : > { %1865 = vmatmul.mubr.msk.f32.gmra.mrb[94].mxu0 %vm263_vm1, %v2260_v9 }
  0xdd   : > { %1899 = vmatmul.mubr.msk.f32.gmra.mrb[94].mxu1 %vm263_vm1, %v2260_v9  ;;  %1059 = vmatprep.mubr.f32.mxu0 %v2001_v0 }
  0xde   : > { %1316 = vmatprep.mubr.f32.mxu1 %v2001_v0 }
  0xe0   : > { %1866 = vmatmul.mubr.msk.f32.gmra.mrb[96].mxu0 %vm263_vm1, %v2271_v10 }
  0xe1   : > { %1900 = vmatmul.mubr.msk.f32.gmra.mrb[96].mxu1 %vm263_vm1, %v2271_v10  ;;  %1065 = vmatprep.mubr.f32.mxu0 %v2001_v0 }
  0xe2   : > { %1322 = vmatprep.mubr.f32.mxu1 %v2001_v0 }
  0xe4   : > { %1867 = vmatmul.mubr.msk.f32.gmra.mrb[98].mxu0 %vm263_vm1, %v2282_v11 }
  0xe5   : > { %1901 = vmatmul.mubr.msk.f32.gmra.mrb[98].mxu1 %vm263_vm1, %v2282_v11  ;;  %1071 = vmatprep.mubr.f32.mxu0 %v2001_v0 }
  0xe6   : > { %1328 = vmatprep.mubr.f32.mxu1 %v2001_v0 }
  0xe8   : > { %1868 = vmatmul.mubr.msk.f32.gmra.mrb[100].mxu0 %vm263_vm1, %v2293_v12 }
  0xe9   : > { %1902 = vmatmul.mubr.msk.f32.gmra.mrb[100].mxu1 %vm263_vm1, %v2293_v12  ;;  %1077 = vmatprep.mubr.f32.mxu0 %v2001_v0 }
  0xea   : > { %1334 = vmatprep.mubr.f32.mxu1 %v2001_v0 }
  0xec   : > { %1869 = vmatmul.mubr.msk.f32.gmra.mrb[102].mxu0 %vm263_vm1, %v2304_v13 }
  0xed   : > { %1903 = vmatmul.mubr.msk.f32.gmra.mrb[102].mxu1 %vm263_vm1, %v2304_v13  ;;  %1083 = vmatprep.mubr.f32.mxu0 %v2001_v0 }
  0xee   : > { %1340 = vmatprep.mubr.f32.mxu1 %v2001_v0 }
  0xf0   : > { %1870 = vmatmul.mubr.msk.f32.gmra.mrb[104].mxu0 %vm263_vm1, %v2315_v14 }
  0xf1   : > { %1904 = vmatmul.mubr.msk.f32.gmra.mrb[104].mxu1 %vm263_vm1, %v2315_v14  ;;  %1089 = vmatprep.mubr.f32.mxu0 %v2001_v0 }
  0xf2   : > { %1346 = vmatprep.mubr.f32.mxu1 %v2001_v0 }
  0xf3   : > { %v451_v26 = vpop.f32.mrb[0].mxu0 }
  0xf4   : > { %1413 = vst [vmem:[%s2571_s8] sm:$0xff] %v451_v26  ;;  %v708_v27 = vpop.f32.mrb[0].mxu1  ;;  %v453_v28 = vpop.f32.mrb[1].mxu0  ;;  %1871 = vmatmul.mubr.msk.f32.gmra.mrb[106].mxu0 %vm263_vm1, %v2326_v15 }
  0xf5   : > { %1415 = vst [vmem:[%s2571_s8 + $0x10] sm:$0xff] %v708_v27  ;;  %1414 = vst [vmem:[%s2571_s8 + $0x8] sm:$0xff] %v453_v28  ;;  %v710_v29 = vpop.f32.mrb[1].mxu1  ;;  %1905 = vmatmul.mubr.msk.f32.gmra.mrb[106].mxu1 %vm263_vm1, %v2326_v15  ;;  %1095 = vmatprep.mubr.f32.mxu0 %v2001_v0 }
  0xf6   : > { %1416 = vst [vmem:[%s2571_s8 + $0x18] sm:$0xff] %v710_v29  ;;  %1352 = vmatprep.mubr.f32.mxu1 %v2001_v0 }
  0xf7   : > { %v457_v30 = vpop.f32.mrb[2].mxu0 }
  0xf8   : > { %1421 = vst [vmem:[%s2571_s8 + $0x40] sm:$0xff] %v457_v30  ;;  %v714_v31 = vpop.f32.mrb[2].mxu1  ;;  %v459_v32 = vpop.f32.mrb[3].mxu0  ;;  %1872 = vmatmul.mubr.msk.f32.gmra.mrb[108].mxu0 %vm263_vm1, %v2337_v16 }
  0xf9   : > { %1423 = vst [vmem:[%s2571_s8 + $0x50] sm:$0xff] %v714_v31  ;;  %1422 = vst [vmem:[%s2571_s8 + $0x48] sm:$0xff] %v459_v32  ;;  %v716_v33 = vpop.f32.mrb[3].mxu1  ;;  %1906 = vmatmul.mubr.msk.f32.gmra.mrb[108].mxu1 %vm263_vm1, %v2337_v16  ;;  %1101 = vmatprep.mubr.f32.mxu0 %v2001_v0 }
  0xfa   : > { %1424 = vst [vmem:[%s2571_s8 + $0x58] sm:$0xff] %v716_v33  ;;  %1358 = vmatprep.mubr.f32.mxu1 %v2001_v0 }
  0xfb   : > { %v463_v34 = vpop.f32.mrb[4].mxu0 }
  0xfc   : > { %1429 = vst [vmem:[%s2571_s8 + $0x80] sm:$0xff] %v463_v34  ;;  %v720_v35 = vpop.f32.mrb[4].mxu1  ;;  %v465_v36 = vpop.f32.mrb[5].mxu0  ;;  %1873 = vmatmul.mubr.msk.f32.gmra.mrb[110].mxu0 %vm263_vm1, %v2348_v17 }
  0xfd   : > { %1431 = vst [vmem:[%s2571_s8 + $0x90] sm:$0xff] %v720_v35  ;;  %1430 = vst [vmem:[%s2571_s8 + $0x88] sm:$0xff] %v465_v36  ;;  %v722_v37 = vpop.f32.mrb[5].mxu1  ;;  %1907 = vmatmul.mubr.msk.f32.gmra.mrb[110].mxu1 %vm263_vm1, %v2348_v17  ;;  %1107 = vmatprep.mubr.f32.mxu0 %v2001_v0 }
  0xfe   : > { %1432 = vst [vmem:[%s2571_s8 + $0x98] sm:$0xff] %v722_v37  ;;  %1364 = vmatprep.mubr.f32.mxu1 %v2001_v0 }
  0xff   : > { %v469_v38 = vpop.f32.mrb[6].mxu0 }
 0x100   : > { %1437 = vst [vmem:[%s2571_s8 + $0xc0] sm:$0xff] %v469_v38  ;;  %v726_v39 = vpop.f32.mrb[6].mxu1  ;;  %v471_v40 = vpop.f32.mrb[7].mxu0  ;;  %1874 = vmatmul.mubr.msk.f32.gmra.mrb[112].mxu0 %vm263_vm1, %v2359_v18 }
 0x101   : > { %1439 = vst [vmem:[%s2571_s8 + $0xd0] sm:$0xff] %v726_v39  ;;  %1438 = vst [vmem:[%s2571_s8 + $0xc8] sm:$0xff] %v471_v40  ;;  %v728_v41 = vpop.f32.mrb[7].mxu1  ;;  %1908 = vmatmul.mubr.msk.f32.gmra.mrb[112].mxu1 %vm263_vm1, %v2359_v18  ;;  %1113 = vmatprep.mubr.f32.mxu0 %v2001_v0 }
 0x102   : > { %1440 = vst [vmem:[%s2571_s8 + $0xd8] sm:$0xff] %v728_v41  ;;  %1370 = vmatprep.mubr.f32.mxu1 %v2001_v0 }
 0x103   : > { %v475_v42 = vpop.f32.mrb[8].mxu0 }
 0x104   : > { %1445 = vst [vmem:[%s2571_s8 + $0x100] sm:$0xff] %v475_v42  ;;  %v732_v43 = vpop.f32.mrb[8].mxu1  ;;  %v477_v44 = vpop.f32.mrb[9].mxu0  ;;  %1875 = vmatmul.mubr.msk.f32.gmra.mrb[114].mxu0 %vm263_vm1, %v2370_v19 }
 0x105   : > { %1447 = vst [vmem:[%s2571_s8 + $0x110] sm:$0xff] %v732_v43  ;;  %1446 = vst [vmem:[%s2571_s8 + $0x108] sm:$0xff] %v477_v44  ;;  %v734_v45 = vpop.f32.mrb[9].mxu1  ;;  %1909 = vmatmul.mubr.msk.f32.gmra.mrb[114].mxu1 %vm263_vm1, %v2370_v19  ;;  %1119 = vmatprep.mubr.f32.mxu0 %v2001_v0 }
 0x106   : > { %1448 = vst [vmem:[%s2571_s8 + $0x118] sm:$0xff] %v734_v45  ;;  %1376 = vmatprep.mubr.f32.mxu1 %v2001_v0 }
 0x107   : > { %v481_v46 = vpop.f32.mrb[10].mxu0 }
 0x108   : > { %1453 = vst [vmem:[%s2571_s8 + $0x140] sm:$0xff] %v481_v46  ;;  %v738_v47 = vpop.f32.mrb[10].mxu1  ;;  %v483_v48 = vpop.f32.mrb[11].mxu0  ;;  %1876 = vmatmul.mubr.msk.f32.gmra.mrb[116].mxu0 %vm263_vm1, %v2381_v20 }
 0x109   : > { %1455 = vst [vmem:[%s2571_s8 + $0x150] sm:$0xff] %v738_v47  ;;  %1454 = vst [vmem:[%s2571_s8 + $0x148] sm:$0xff] %v483_v48  ;;  %v740_v49 = vpop.f32.mrb[11].mxu1  ;;  %1910 = vmatmul.mubr.msk.f32.gmra.mrb[116].mxu1 %vm263_vm1, %v2381_v20  ;;  %1125 = vmatprep.mubr.f32.mxu0 %v2001_v0 }
 0x10a   : > { %1456 = vst [vmem:[%s2571_s8 + $0x158] sm:$0xff] %v740_v49  ;;  %1382 = vmatprep.mubr.f32.mxu1 %v2001_v0 }
 0x10b   : > { %v487_v50 = vpop.f32.mrb[12].mxu0 }
 0x10c   : > { %1461 = vst [vmem:[%s2571_s8 + $0x180] sm:$0xff] %v487_v50  ;;  %v744_v51 = vpop.f32.mrb[12].mxu1  ;;  %v489_v52 = vpop.f32.mrb[13].mxu0  ;;  %1877 = vmatmul.mubr.msk.f32.gmra.mrb[118].mxu0 %vm263_vm1, %v2392_v21 }
 0x10d   : > { %1463 = vst [vmem:[%s2571_s8 + $0x190] sm:$0xff] %v744_v51  ;;  %1462 = vst [vmem:[%s2571_s8 + $0x188] sm:$0xff] %v489_v52  ;;  %v746_v53 = vpop.f32.mrb[13].mxu1  ;;  %1911 = vmatmul.mubr.msk.f32.gmra.mrb[118].mxu1 %vm263_vm1, %v2392_v21  ;;  %1131 = vmatprep.mubr.f32.mxu0 %v2001_v0 }
 0x10e   : > { %1464 = vst [vmem:[%s2571_s8 + $0x198] sm:$0xff] %v746_v53  ;;  %1388 = vmatprep.mubr.f32.mxu1 %v2001_v0 }
 0x10f   : > { %v493_v54 = vpop.f32.mrb[14].mxu0 }
 0x110   : > { %1469 = vst [vmem:[%s2571_s8 + $0x1c0] sm:$0xff] %v493_v54  ;;  %v750_v55 = vpop.f32.mrb[14].mxu1  ;;  %v495_v56 = vpop.f32.mrb[15].mxu0  ;;  %1878 = vmatmul.mubr.msk.f32.gmra.mrb[120].mxu0 %vm263_vm1, %v2403_v22 }
 0x111   : > { %1471 = vst [vmem:[%s2571_s8 + $0x1d0] sm:$0xff] %v750_v55  ;;  %1470 = vst [vmem:[%s2571_s8 + $0x1c8] sm:$0xff] %v495_v56  ;;  %v752_v57 = vpop.f32.mrb[15].mxu1  ;;  %1912 = vmatmul.mubr.msk.f32.gmra.mrb[120].mxu1 %vm263_vm1, %v2403_v22  ;;  %1137 = vmatprep.mubr.f32.mxu0 %v2001_v0 }
 0x112   : > { %1472 = vst [vmem:[%s2571_s8 + $0x1d8] sm:$0xff] %v752_v57  ;;  %1394 = vmatprep.mubr.f32.mxu1 %v2001_v0 }
 0x113   : > { %v499_v58 = vpop.f32.mrb[16].mxu0 }
 0x114   : > { %1477 = vst [vmem:[%s2571_s8 + $0x200] sm:$0xff] %v499_v58  ;;  %v756_v59 = vpop.f32.mrb[16].mxu1  ;;  %v501_v60 = vpop.f32.mrb[17].mxu0  ;;  %1879 = vmatmul.mubr.msk.f32.gmra.mrb[122].mxu0 %vm263_vm1, %v2414_v23 }
 0x115   : > { %1479 = vst [vmem:[%s2571_s8 + $0x210] sm:$0xff] %v756_v59  ;;  %1478 = vst [vmem:[%s2571_s8 + $0x208] sm:$0xff] %v501_v60  ;;  %v758_v61 = vpop.f32.mrb[17].mxu1  ;;  %1913 = vmatmul.mubr.msk.f32.gmra.mrb[122].mxu1 %vm263_vm1, %v2414_v23  ;;  %1143 = vmatprep.mubr.f32.mxu0 %v2001_v0 }
 0x116   : > { %1480 = vst [vmem:[%s2571_s8 + $0x218] sm:$0xff] %v758_v61  ;;  %1400 = vmatprep.mubr.f32.mxu1 %v2001_v0 }
 0x117   : > { %v505_v62 = vpop.f32.mrb[18].mxu0 }
 0x118   : > { %1485 = vst [vmem:[%s2571_s8 + $0x240] sm:$0xff] %v505_v62  ;;  %v762_v63 = vpop.f32.mrb[18].mxu1  ;;  %v507_v1 = vpop.f32.mrb[19].mxu0  ;;  %1880 = vmatmul.mubr.msk.f32.gmra.mrb[124].mxu0 %vm263_vm1, %v2425_v24 }
 0x119   : > { %1487 = vst [vmem:[%s2571_s8 + $0x250] sm:$0xff] %v762_v63  ;;  %1486 = vst [vmem:[%s2571_s8 + $0x248] sm:$0xff] %v507_v1  ;;  %v764_v2 = vpop.f32.mrb[19].mxu1  ;;  %1914 = vmatmul.mubr.msk.f32.gmra.mrb[124].mxu1 %vm263_vm1, %v2425_v24  ;;  %1149 = vmatprep.mubr.f32.mxu0 %v2001_v0 }
 0x11a   : > { %1488 = vst [vmem:[%s2571_s8 + $0x258] sm:$0xff] %v764_v2  ;;  %1406 = vmatprep.mubr.f32.mxu1 %v2001_v0 }
 0x11b   : > { %v511_v3 = vpop.f32.mrb[20].mxu0 }
 0x11c   : > { %1493 = vst [vmem:[%s2571_s8 + $0x280] sm:$0xff] %v511_v3  ;;  %v768_v4 = vpop.f32.mrb[20].mxu1  ;;  %v513_v5 = vpop.f32.mrb[21].mxu0  ;;  %1881 = vmatmul.mubr.msk.f32.gmra.mrb[126].mxu0 %vm263_vm1, %v2436_v25 }
 0x11d   : > { %1495 = vst [vmem:[%s2571_s8 + $0x290] sm:$0xff] %v768_v4  ;;  %1494 = vst [vmem:[%s2571_s8 + $0x288] sm:$0xff] %v513_v5  ;;  %v770_v6 = vpop.f32.mrb[21].mxu1  ;;  %1915 = vmatmul.mubr.msk.f32.gmra.mrb[126].mxu1 %vm263_vm1, %v2436_v25 }
 0x11e   : > { %1496 = vst [vmem:[%s2571_s8 + $0x298] sm:$0xff] %v770_v6 }
 0x11f   : > { %v517_v0 = vpop.f32.mrb[22].mxu0 }
 0x120   : > { %1501 = vst [vmem:[%s2571_s8 + $0x2c0] sm:$0xff] %v517_v0  ;;  %v774_v7 = vpop.f32.mrb[22].mxu1  ;;  %v519_v8 = vpop.f32.mrb[23].mxu0 }
 0x121   : > { %1503 = vst [vmem:[%s2571_s8 + $0x2d0] sm:$0xff] %v774_v7  ;;  %1502 = vst [vmem:[%s2571_s8 + $0x2c8] sm:$0xff] %v519_v8  ;;  %v776_v9 = vpop.f32.mrb[23].mxu1 }
 0x122   : > { %1504 = vst [vmem:[%s2571_s8 + $0x2d8] sm:$0xff] %v776_v9 }
 0x123   : > { %v523_v10 = vpop.f32.mrb[24].mxu0 }
 0x124   : > { %1509 = vst [vmem:[%s2571_s8 + $0x300] sm:$0xff] %v523_v10  ;;  %v780_v11 = vpop.f32.mrb[24].mxu1  ;;  %v525_v12 = vpop.f32.mrb[25].mxu0 }
 0x125   : > { %1511 = vst [vmem:[%s2571_s8 + $0x310] sm:$0xff] %v780_v11  ;;  %1510 = vst [vmem:[%s2571_s8 + $0x308] sm:$0xff] %v525_v12  ;;  %v782_v13 = vpop.f32.mrb[25].mxu1 }
 0x126   : > { %1512 = vst [vmem:[%s2571_s8 + $0x318] sm:$0xff] %v782_v13 }
 0x127   : > { %v529_v14 = vpop.f32.mrb[26].mxu0 }
 0x128   : > { %1517 = vst [vmem:[%s2571_s8 + $0x340] sm:$0xff] %v529_v14  ;;  %v786_v15 = vpop.f32.mrb[26].mxu1  ;;  %v531_v16 = vpop.f32.mrb[27].mxu0 }
 0x129   : > { %1519 = vst [vmem:[%s2571_s8 + $0x350] sm:$0xff] %v786_v15  ;;  %1518 = vst [vmem:[%s2571_s8 + $0x348] sm:$0xff] %v531_v16  ;;  %v788_v17 = vpop.f32.mrb[27].mxu1 }
 0x12a   : > { %1520 = vst [vmem:[%s2571_s8 + $0x358] sm:$0xff] %v788_v17 }
 0x12b   : > { %v535_v18 = vpop.f32.mrb[28].mxu0 }
 0x12c   : > { %1525 = vst [vmem:[%s2571_s8 + $0x380] sm:$0xff] %v535_v18  ;;  %v792_v19 = vpop.f32.mrb[28].mxu1  ;;  %v537_v20 = vpop.f32.mrb[29].mxu0 }
 0x12d   : > { %1527 = vst [vmem:[%s2571_s8 + $0x390] sm:$0xff] %v792_v19  ;;  %1526 = vst [vmem:[%s2571_s8 + $0x388] sm:$0xff] %v537_v20  ;;  %v794_v21 = vpop.f32.mrb[29].mxu1 }
 0x12e   : > { %1528 = vst [vmem:[%s2571_s8 + $0x398] sm:$0xff] %v794_v21 }
 0x12f   : > { %v541_v22 = vpop.f32.mrb[30].mxu0 }
 0x130   : > { %1533 = vst [vmem:[%s2571_s8 + $0x3c0] sm:$0xff] %v541_v22  ;;  %v798_v23 = vpop.f32.mrb[30].mxu1  ;;  %v543_v24 = vpop.f32.mrb[31].mxu0 }
 0x131   : > { %1535 = vst [vmem:[%s2571_s8 + $0x3d0] sm:$0xff] %v798_v23  ;;  %1534 = vst [vmem:[%s2571_s8 + $0x3c8] sm:$0xff] %v543_v24  ;;  %v800_v25 = vpop.f32.mrb[31].mxu1 }
 0x132   : > { %1536 = vst [vmem:[%s2571_s8 + $0x3d8] sm:$0xff] %v800_v25 }
 0x133   : > { %v547_v26 = vpop.f32.mrb[32].mxu0 }
 0x134   : > { %1541 = vst [vmem:[%s2571_s8 + $0x400] sm:$0xff] %v547_v26  ;;  %v804_v27 = vpop.f32.mrb[32].mxu1  ;;  %v549_v28 = vpop.f32.mrb[33].mxu0 }
 0x135   : > { %1543 = vst [vmem:[%s2571_s8 + $0x410] sm:$0xff] %v804_v27  ;;  %1542 = vst [vmem:[%s2571_s8 + $0x408] sm:$0xff] %v549_v28  ;;  %v806_v29 = vpop.f32.mrb[33].mxu1 }
 0x136   : > { %1544 = vst [vmem:[%s2571_s8 + $0x418] sm:$0xff] %v806_v29 }
 0x137   : > { %v553_v30 = vpop.f32.mrb[34].mxu0 }
 0x138   : > { %1549 = vst [vmem:[%s2571_s8 + $0x440] sm:$0xff] %v553_v30  ;;  %v810_v31 = vpop.f32.mrb[34].mxu1  ;;  %v555_v32 = vpop.f32.mrb[35].mxu0 }
 0x139   : > { %1551 = vst [vmem:[%s2571_s8 + $0x450] sm:$0xff] %v810_v31  ;;  %1550 = vst [vmem:[%s2571_s8 + $0x448] sm:$0xff] %v555_v32  ;;  %v812_v33 = vpop.f32.mrb[35].mxu1 }
 0x13a   : > { %1552 = vst [vmem:[%s2571_s8 + $0x458] sm:$0xff] %v812_v33 }
 0x13b   : > { %v559_v34 = vpop.f32.mrb[36].mxu0 }
 0x13c   : > { %1557 = vst [vmem:[%s2571_s8 + $0x480] sm:$0xff] %v559_v34  ;;  %v816_v35 = vpop.f32.mrb[36].mxu1  ;;  %v561_v36 = vpop.f32.mrb[37].mxu0 }
 0x13d   : > { %1559 = vst [vmem:[%s2571_s8 + $0x490] sm:$0xff] %v816_v35  ;;  %1558 = vst [vmem:[%s2571_s8 + $0x488] sm:$0xff] %v561_v36  ;;  %v818_v37 = vpop.f32.mrb[37].mxu1 }
 0x13e   : > { %1560 = vst [vmem:[%s2571_s8 + $0x498] sm:$0xff] %v818_v37 }
 0x13f   : > { %v565_v38 = vpop.f32.mrb[38].mxu0 }
 0x140   : > { %1565 = vst [vmem:[%s2571_s8 + $0x4c0] sm:$0xff] %v565_v38  ;;  %v822_v39 = vpop.f32.mrb[38].mxu1  ;;  %v567_v40 = vpop.f32.mrb[39].mxu0 }
 0x141   : > { %1567 = vst [vmem:[%s2571_s8 + $0x4d0] sm:$0xff] %v822_v39  ;;  %1566 = vst [vmem:[%s2571_s8 + $0x4c8] sm:$0xff] %v567_v40  ;;  %v824_v41 = vpop.f32.mrb[39].mxu1 }
 0x142   : > { %1568 = vst [vmem:[%s2571_s8 + $0x4d8] sm:$0xff] %v824_v41 }
 0x143   : > { %v571_v42 = vpop.f32.mrb[40].mxu0 }
 0x144   : > { %1573 = vst [vmem:[%s2571_s8 + $0x500] sm:$0xff] %v571_v42  ;;  %v828_v43 = vpop.f32.mrb[40].mxu1  ;;  %v573_v44 = vpop.f32.mrb[41].mxu0 }
 0x145   : > { %1575 = vst [vmem:[%s2571_s8 + $0x510] sm:$0xff] %v828_v43  ;;  %1574 = vst [vmem:[%s2571_s8 + $0x508] sm:$0xff] %v573_v44  ;;  %v830_v45 = vpop.f32.mrb[41].mxu1 }
 0x146   : > { %1576 = vst [vmem:[%s2571_s8 + $0x518] sm:$0xff] %v830_v45 }
 0x147   : > { %v577_v46 = vpop.f32.mrb[42].mxu0 }
 0x148   : > { %1581 = vst [vmem:[%s2571_s8 + $0x540] sm:$0xff] %v577_v46  ;;  %v834_v47 = vpop.f32.mrb[42].mxu1  ;;  %v579_v48 = vpop.f32.mrb[43].mxu0 }
 0x149   : > { %1583 = vst [vmem:[%s2571_s8 + $0x550] sm:$0xff] %v834_v47  ;;  %1582 = vst [vmem:[%s2571_s8 + $0x548] sm:$0xff] %v579_v48  ;;  %v836_v49 = vpop.f32.mrb[43].mxu1 }
 0x14a   : > { %1584 = vst [vmem:[%s2571_s8 + $0x558] sm:$0xff] %v836_v49 }
 0x14b   : > { %v583_v50 = vpop.f32.mrb[44].mxu0 }
 0x14c   : > { %1589 = vst [vmem:[%s2571_s8 + $0x580] sm:$0xff] %v583_v50  ;;  %v840_v51 = vpop.f32.mrb[44].mxu1  ;;  %v585_v52 = vpop.f32.mrb[45].mxu0 }
 0x14d   : > { %1591 = vst [vmem:[%s2571_s8 + $0x590] sm:$0xff] %v840_v51  ;;  %1590 = vst [vmem:[%s2571_s8 + $0x588] sm:$0xff] %v585_v52  ;;  %v842_v53 = vpop.f32.mrb[45].mxu1 }
 0x14e   : > { %1592 = vst [vmem:[%s2571_s8 + $0x598] sm:$0xff] %v842_v53 }
 0x14f   : > { %v589_v54 = vpop.f32.mrb[46].mxu0 }
 0x150   : > { %1597 = vst [vmem:[%s2571_s8 + $0x5c0] sm:$0xff] %v589_v54  ;;  %v846_v55 = vpop.f32.mrb[46].mxu1  ;;  %v591_v56 = vpop.f32.mrb[47].mxu0 }
 0x151   : > { %1599 = vst [vmem:[%s2571_s8 + $0x5d0] sm:$0xff] %v846_v55  ;;  %1598 = vst [vmem:[%s2571_s8 + $0x5c8] sm:$0xff] %v591_v56  ;;  %v848_v57 = vpop.f32.mrb[47].mxu1 }
 0x152   : > { %1600 = vst [vmem:[%s2571_s8 + $0x5d8] sm:$0xff] %v848_v57 }
 0x153   : > { %v595_v58 = vpop.f32.mrb[48].mxu0 }
 0x154   : > { %1605 = vst [vmem:[%s2571_s8 + $0x600] sm:$0xff] %v595_v58  ;;  %v852_v59 = vpop.f32.mrb[48].mxu1  ;;  %v597_v60 = vpop.f32.mrb[49].mxu0 }
 0x155   : > { %1607 = vst [vmem:[%s2571_s8 + $0x610] sm:$0xff] %v852_v59  ;;  %1606 = vst [vmem:[%s2571_s8 + $0x608] sm:$0xff] %v597_v60  ;;  %v854_v61 = vpop.f32.mrb[49].mxu1 }
 0x156   : > { %1608 = vst [vmem:[%s2571_s8 + $0x618] sm:$0xff] %v854_v61 }
 0x157   : > { %v601_v62 = vpop.f32.mrb[50].mxu0 }
 0x158   : > { %1613 = vst [vmem:[%s2571_s8 + $0x640] sm:$0xff] %v601_v62  ;;  %v858_v63 = vpop.f32.mrb[50].mxu1  ;;  %v603_v1 = vpop.f32.mrb[51].mxu0 }
 0x159   : > { %1615 = vst [vmem:[%s2571_s8 + $0x650] sm:$0xff] %v858_v63  ;;  %1614 = vst [vmem:[%s2571_s8 + $0x648] sm:$0xff] %v603_v1  ;;  %v860_v2 = vpop.f32.mrb[51].mxu1 }
 0x15a   : > { %1616 = vst [vmem:[%s2571_s8 + $0x658] sm:$0xff] %v860_v2 }
 0x15b   : > { %v607_v3 = vpop.f32.mrb[52].mxu0 }
 0x15c   : > { %1621 = vst [vmem:[%s2571_s8 + $0x680] sm:$0xff] %v607_v3  ;;  %v864_v4 = vpop.f32.mrb[52].mxu1  ;;  %v609_v5 = vpop.f32.mrb[53].mxu0 }
 0x15d   : > { %1623 = vst [vmem:[%s2571_s8 + $0x690] sm:$0xff] %v864_v4  ;;  %1622 = vst [vmem:[%s2571_s8 + $0x688] sm:$0xff] %v609_v5  ;;  %v866_v6 = vpop.f32.mrb[53].mxu1 }
 0x15e   : > { %1624 = vst [vmem:[%s2571_s8 + $0x698] sm:$0xff] %v866_v6 }
 0x15f   : > { %v613_v0 = vpop.f32.mrb[54].mxu0 }
 0x160   : > { %1629 = vst [vmem:[%s2571_s8 + $0x6c0] sm:$0xff] %v613_v0  ;;  %v870_v7 = vpop.f32.mrb[54].mxu1  ;;  %v615_v8 = vpop.f32.mrb[55].mxu0 }
 0x161   : > { %1631 = vst [vmem:[%s2571_s8 + $0x6d0] sm:$0xff] %v870_v7  ;;  %1630 = vst [vmem:[%s2571_s8 + $0x6c8] sm:$0xff] %v615_v8  ;;  %v872_v9 = vpop.f32.mrb[55].mxu1 }
 0x162   : > { %1632 = vst [vmem:[%s2571_s8 + $0x6d8] sm:$0xff] %v872_v9 }
 0x163   : > { %v619_v10 = vpop.f32.mrb[56].mxu0 }
 0x164   : > { %1637 = vst [vmem:[%s2571_s8 + $0x700] sm:$0xff] %v619_v10  ;;  %v876_v11 = vpop.f32.mrb[56].mxu1  ;;  %v621_v12 = vpop.f32.mrb[57].mxu0 }
 0x165   : > { %1639 = vst [vmem:[%s2571_s8 + $0x710] sm:$0xff] %v876_v11  ;;  %1638 = vst [vmem:[%s2571_s8 + $0x708] sm:$0xff] %v621_v12  ;;  %v878_v13 = vpop.f32.mrb[57].mxu1 }
 0x166   : > { %1640 = vst [vmem:[%s2571_s8 + $0x718] sm:$0xff] %v878_v13 }
 0x167   : > { %v625_v14 = vpop.f32.mrb[58].mxu0 }
 0x168   : > { %1645 = vst [vmem:[%s2571_s8 + $0x740] sm:$0xff] %v625_v14  ;;  %v882_v15 = vpop.f32.mrb[58].mxu1  ;;  %v627_v16 = vpop.f32.mrb[59].mxu0 }
 0x169   : > { %1647 = vst [vmem:[%s2571_s8 + $0x750] sm:$0xff] %v882_v15  ;;  %1646 = vst [vmem:[%s2571_s8 + $0x748] sm:$0xff] %v627_v16  ;;  %v884_v17 = vpop.f32.mrb[59].mxu1 }
 0x16a   : > { %1648 = vst [vmem:[%s2571_s8 + $0x758] sm:$0xff] %v884_v17 }
 0x16b   : > { %v631_v18 = vpop.f32.mrb[60].mxu0 }
 0x16c   : > { %1653 = vst [vmem:[%s2571_s8 + $0x780] sm:$0xff] %v631_v18  ;;  %v888_v19 = vpop.f32.mrb[60].mxu1  ;;  %v633_v20 = vpop.f32.mrb[61].mxu0 }
 0x16d   : > { %1655 = vst [vmem:[%s2571_s8 + $0x790] sm:$0xff] %v888_v19  ;;  %1654 = vst [vmem:[%s2571_s8 + $0x788] sm:$0xff] %v633_v20  ;;  %v890_v21 = vpop.f32.mrb[61].mxu1 }
 0x16e   : > { %1656 = vst [vmem:[%s2571_s8 + $0x798] sm:$0xff] %v890_v21 }
 0x16f   : > { %v637_v22 = vpop.f32.mrb[62].mxu0 }
 0x170   : > { %1661 = vst [vmem:[%s2571_s8 + $0x7c0] sm:$0xff] %v637_v22  ;;  %v894_v23 = vpop.f32.mrb[62].mxu1  ;;  %v639_v24 = vpop.f32.mrb[63].mxu0 }
 0x171   : > { %1663 = vst [vmem:[%s2571_s8 + $0x7d0] sm:$0xff] %v894_v23  ;;  %1662 = vst [vmem:[%s2571_s8 + $0x7c8] sm:$0xff] %v639_v24  ;;  %v896_v25 = vpop.f32.mrb[63].mxu1 }
 0x172   : > { %1664 = vst [vmem:[%s2571_s8 + $0x7d8] sm:$0xff] %v896_v25 }
 0x173   : > { %v965_v26 = vpop.f32.mrb[64].mxu0 }
 0x174   : > { %1417 = vst [vmem:[%s2571_s8 + $0x20] sm:$0xff] %v965_v26  ;;  %v1222_v27 = vpop.f32.mrb[64].mxu1  ;;  %v967_v28 = vpop.f32.mrb[65].mxu0 }
 0x175   : > { %1419 = vst [vmem:[%s2571_s8 + $0x30] sm:$0xff] %v1222_v27  ;;  %1418 = vst [vmem:[%s2571_s8 + $0x28] sm:$0xff] %v967_v28  ;;  %v1224_v29 = vpop.f32.mrb[65].mxu1 }
 0x176   : > { %1420 = vst [vmem:[%s2571_s8 + $0x38] sm:$0xff] %v1224_v29 }
 0x177   : > { %v971_v30 = vpop.f32.mrb[66].mxu0 }
 0x178   : > { %1425 = vst [vmem:[%s2571_s8 + $0x60] sm:$0xff] %v971_v30  ;;  %v1228_v31 = vpop.f32.mrb[66].mxu1  ;;  %v973_v32 = vpop.f32.mrb[67].mxu0 }
 0x179   : > { %1427 = vst [vmem:[%s2571_s8 + $0x70] sm:$0xff] %v1228_v31  ;;  %1426 = vst [vmem:[%s2571_s8 + $0x68] sm:$0xff] %v973_v32  ;;  %v1230_v33 = vpop.f32.mrb[67].mxu1 }
 0x17a   : > { %1428 = vst [vmem:[%s2571_s8 + $0x78] sm:$0xff] %v1230_v33 }
 0x17b   : > { %v977_v34 = vpop.f32.mrb[68].mxu0 }
 0x17c   : > { %1433 = vst [vmem:[%s2571_s8 + $0xa0] sm:$0xff] %v977_v34  ;;  %v1234_v35 = vpop.f32.mrb[68].mxu1  ;;  %v979_v36 = vpop.f32.mrb[69].mxu0 }
 0x17d   : > { %1435 = vst [vmem:[%s2571_s8 + $0xb0] sm:$0xff] %v1234_v35  ;;  %1434 = vst [vmem:[%s2571_s8 + $0xa8] sm:$0xff] %v979_v36  ;;  %v1236_v37 = vpop.f32.mrb[69].mxu1 }
 0x17e   : > { %1436 = vst [vmem:[%s2571_s8 + $0xb8] sm:$0xff] %v1236_v37 }
 0x17f   : > { %v983_v38 = vpop.f32.mrb[70].mxu0 }
 0x180   : > { %1441 = vst [vmem:[%s2571_s8 + $0xe0] sm:$0xff] %v983_v38  ;;  %v1240_v39 = vpop.f32.mrb[70].mxu1  ;;  %v985_v40 = vpop.f32.mrb[71].mxu0 }
 0x181   : > { %1443 = vst [vmem:[%s2571_s8 + $0xf0] sm:$0xff] %v1240_v39  ;;  %1442 = vst [vmem:[%s2571_s8 + $0xe8] sm:$0xff] %v985_v40  ;;  %v1242_v41 = vpop.f32.mrb[71].mxu1 }
 0x182   : > { %1444 = vst [vmem:[%s2571_s8 + $0xf8] sm:$0xff] %v1242_v41 }
 0x183   : > { %v989_v42 = vpop.f32.mrb[72].mxu0 }
 0x184   : > { %1449 = vst [vmem:[%s2571_s8 + $0x120] sm:$0xff] %v989_v42  ;;  %v1246_v43 = vpop.f32.mrb[72].mxu1  ;;  %v991_v44 = vpop.f32.mrb[73].mxu0 }
 0x185   : > { %1451 = vst [vmem:[%s2571_s8 + $0x130] sm:$0xff] %v1246_v43  ;;  %1450 = vst [vmem:[%s2571_s8 + $0x128] sm:$0xff] %v991_v44  ;;  %v1248_v45 = vpop.f32.mrb[73].mxu1 }
 0x186   : > { %1452 = vst [vmem:[%s2571_s8 + $0x138] sm:$0xff] %v1248_v45 }
 0x187   : > { %v995_v46 = vpop.f32.mrb[74].mxu0 }
 0x188   : > { %1457 = vst [vmem:[%s2571_s8 + $0x160] sm:$0xff] %v995_v46  ;;  %v1252_v47 = vpop.f32.mrb[74].mxu1  ;;  %v997_v48 = vpop.f32.mrb[75].mxu0 }
 0x189   : > { %1459 = vst [vmem:[%s2571_s8 + $0x170] sm:$0xff] %v1252_v47  ;;  %1458 = vst [vmem:[%s2571_s8 + $0x168] sm:$0xff] %v997_v48  ;;  %v1254_v49 = vpop.f32.mrb[75].mxu1 }
 0x18a   : > { %1460 = vst [vmem:[%s2571_s8 + $0x178] sm:$0xff] %v1254_v49 }
 0x18b   : > { %v1001_v50 = vpop.f32.mrb[76].mxu0 }
 0x18c   : > { %1465 = vst [vmem:[%s2571_s8 + $0x1a0] sm:$0xff] %v1001_v50  ;;  %v1258_v51 = vpop.f32.mrb[76].mxu1  ;;  %v1003_v52 = vpop.f32.mrb[77].mxu0 }
 0x18d   : > { %1467 = vst [vmem:[%s2571_s8 + $0x1b0] sm:$0xff] %v1258_v51  ;;  %1466 = vst [vmem:[%s2571_s8 + $0x1a8] sm:$0xff] %v1003_v52  ;;  %v1260_v53 = vpop.f32.mrb[77].mxu1 }
 0x18e   : > { %1468 = vst [vmem:[%s2571_s8 + $0x1b8] sm:$0xff] %v1260_v53 }
 0x18f   : > { %v1007_v54 = vpop.f32.mrb[78].mxu0 }
 0x190   : > { %1473 = vst [vmem:[%s2571_s8 + $0x1e0] sm:$0xff] %v1007_v54  ;;  %v1264_v55 = vpop.f32.mrb[78].mxu1  ;;  %v1009_v56 = vpop.f32.mrb[79].mxu0 }
 0x191   : > { %1475 = vst [vmem:[%s2571_s8 + $0x1f0] sm:$0xff] %v1264_v55  ;;  %1474 = vst [vmem:[%s2571_s8 + $0x1e8] sm:$0xff] %v1009_v56  ;;  %v1266_v57 = vpop.f32.mrb[79].mxu1 }
 0x192   : > { %1476 = vst [vmem:[%s2571_s8 + $0x1f8] sm:$0xff] %v1266_v57 }
 0x193   : > { %v1013_v58 = vpop.f32.mrb[80].mxu0 }
 0x194   : > { %1481 = vst [vmem:[%s2571_s8 + $0x220] sm:$0xff] %v1013_v58  ;;  %v1270_v59 = vpop.f32.mrb[80].mxu1  ;;  %v1015_v60 = vpop.f32.mrb[81].mxu0 }
 0x195   : > { %1483 = vst [vmem:[%s2571_s8 + $0x230] sm:$0xff] %v1270_v59  ;;  %1482 = vst [vmem:[%s2571_s8 + $0x228] sm:$0xff] %v1015_v60  ;;  %v1272_v61 = vpop.f32.mrb[81].mxu1 }
 0x196   : > { %1484 = vst [vmem:[%s2571_s8 + $0x238] sm:$0xff] %v1272_v61 }
 0x197   : > { %v1019_v62 = vpop.f32.mrb[82].mxu0 }
 0x198   : > { %1489 = vst [vmem:[%s2571_s8 + $0x260] sm:$0xff] %v1019_v62  ;;  %v1276_v63 = vpop.f32.mrb[82].mxu1  ;;  %v1021_v1 = vpop.f32.mrb[83].mxu0 }
 0x199   : > { %1491 = vst [vmem:[%s2571_s8 + $0x270] sm:$0xff] %v1276_v63  ;;  %1490 = vst [vmem:[%s2571_s8 + $0x268] sm:$0xff] %v1021_v1  ;;  %v1278_v2 = vpop.f32.mrb[83].mxu1 }
 0x19a   : > { %1492 = vst [vmem:[%s2571_s8 + $0x278] sm:$0xff] %v1278_v2 }
 0x19b   : > { %v1025_v3 = vpop.f32.mrb[84].mxu0 }
 0x19c   : > { %1497 = vst [vmem:[%s2571_s8 + $0x2a0] sm:$0xff] %v1025_v3  ;;  %v1282_v4 = vpop.f32.mrb[84].mxu1  ;;  %v1027_v5 = vpop.f32.mrb[85].mxu0 }
 0x19d   : > { %1499 = vst [vmem:[%s2571_s8 + $0x2b0] sm:$0xff] %v1282_v4  ;;  %1498 = vst [vmem:[%s2571_s8 + $0x2a8] sm:$0xff] %v1027_v5  ;;  %v1284_v6 = vpop.f32.mrb[85].mxu1 }
 0x19e   : > { %1500 = vst [vmem:[%s2571_s8 + $0x2b8] sm:$0xff] %v1284_v6 }
 0x19f   : > { %v1031_v0 = vpop.f32.mrb[86].mxu0 }
 0x1a0   : > { %1505 = vst [vmem:[%s2571_s8 + $0x2e0] sm:$0xff] %v1031_v0  ;;  %v1288_v7 = vpop.f32.mrb[86].mxu1  ;;  %v1033_v8 = vpop.f32.mrb[87].mxu0 }
 0x1a1   : > { %1507 = vst [vmem:[%s2571_s8 + $0x2f0] sm:$0xff] %v1288_v7  ;;  %1506 = vst [vmem:[%s2571_s8 + $0x2e8] sm:$0xff] %v1033_v8  ;;  %v1290_v9 = vpop.f32.mrb[87].mxu1 }
 0x1a2   : > { %1508 = vst [vmem:[%s2571_s8 + $0x2f8] sm:$0xff] %v1290_v9 }
 0x1a3   : > { %v1037_v10 = vpop.f32.mrb[88].mxu0 }
 0x1a4   : > { %1513 = vst [vmem:[%s2571_s8 + $0x320] sm:$0xff] %v1037_v10  ;;  %v1294_v11 = vpop.f32.mrb[88].mxu1  ;;  %v1039_v12 = vpop.f32.mrb[89].mxu0 }
 0x1a5   : > { %1515 = vst [vmem:[%s2571_s8 + $0x330] sm:$0xff] %v1294_v11  ;;  %1514 = vst [vmem:[%s2571_s8 + $0x328] sm:$0xff] %v1039_v12  ;;  %v1296_v13 = vpop.f32.mrb[89].mxu1 }
 0x1a6   : > { %1516 = vst [vmem:[%s2571_s8 + $0x338] sm:$0xff] %v1296_v13 }
 0x1a7   : > { %v1043_v14 = vpop.f32.mrb[90].mxu0 }
 0x1a8   : > { %1521 = vst [vmem:[%s2571_s8 + $0x360] sm:$0xff] %v1043_v14  ;;  %v1300_v15 = vpop.f32.mrb[90].mxu1  ;;  %v1045_v16 = vpop.f32.mrb[91].mxu0 }
 0x1a9   : > { %1523 = vst [vmem:[%s2571_s8 + $0x370] sm:$0xff] %v1300_v15  ;;  %1522 = vst [vmem:[%s2571_s8 + $0x368] sm:$0xff] %v1045_v16  ;;  %v1302_v17 = vpop.f32.mrb[91].mxu1 }
 0x1aa   : > { %1524 = vst [vmem:[%s2571_s8 + $0x378] sm:$0xff] %v1302_v17 }
 0x1ab   : > { %v1049_v18 = vpop.f32.mrb[92].mxu0 }
 0x1ac   : > { %1529 = vst [vmem:[%s2571_s8 + $0x3a0] sm:$0xff] %v1049_v18  ;;  %v1306_v19 = vpop.f32.mrb[92].mxu1  ;;  %v1051_v20 = vpop.f32.mrb[93].mxu0 }
 0x1ad   : > { %1531 = vst [vmem:[%s2571_s8 + $0x3b0] sm:$0xff] %v1306_v19  ;;  %1530 = vst [vmem:[%s2571_s8 + $0x3a8] sm:$0xff] %v1051_v20  ;;  %v1308_v21 = vpop.f32.mrb[93].mxu1 }
 0x1ae   : > { %1532 = vst [vmem:[%s2571_s8 + $0x3b8] sm:$0xff] %v1308_v21 }
 0x1af   : > { %v1055_v22 = vpop.f32.mrb[94].mxu0 }
 0x1b0   : > { %1537 = vst [vmem:[%s2571_s8 + $0x3e0] sm:$0xff] %v1055_v22  ;;  %v1312_v23 = vpop.f32.mrb[94].mxu1  ;;  %v1057_v24 = vpop.f32.mrb[95].mxu0 }
 0x1b1   : > { %1539 = vst [vmem:[%s2571_s8 + $0x3f0] sm:$0xff] %v1312_v23  ;;  %1538 = vst [vmem:[%s2571_s8 + $0x3e8] sm:$0xff] %v1057_v24  ;;  %v1314_v25 = vpop.f32.mrb[95].mxu1 }
 0x1b2   : > { %1540 = vst [vmem:[%s2571_s8 + $0x3f8] sm:$0xff] %v1314_v25 }
 0x1b3   : > { %v1061_v26 = vpop.f32.mrb[96].mxu0 }
 0x1b4   : > { %1545 = vst [vmem:[%s2571_s8 + $0x420] sm:$0xff] %v1061_v26  ;;  %v1318_v27 = vpop.f32.mrb[96].mxu1  ;;  %v1063_v28 = vpop.f32.mrb[97].mxu0 }
 0x1b5   : > { %1547 = vst [vmem:[%s2571_s8 + $0x430] sm:$0xff] %v1318_v27  ;;  %1546 = vst [vmem:[%s2571_s8 + $0x428] sm:$0xff] %v1063_v28  ;;  %v1320_v29 = vpop.f32.mrb[97].mxu1 }
 0x1b6   : > { %1548 = vst [vmem:[%s2571_s8 + $0x438] sm:$0xff] %v1320_v29 }
 0x1b7   : > { %v1067_v30 = vpop.f32.mrb[98].mxu0 }
 0x1b8   : > { %1553 = vst [vmem:[%s2571_s8 + $0x460] sm:$0xff] %v1067_v30  ;;  %v1324_v31 = vpop.f32.mrb[98].mxu1  ;;  %v1069_v32 = vpop.f32.mrb[99].mxu0 }
 0x1b9   : > { %1555 = vst [vmem:[%s2571_s8 + $0x470] sm:$0xff] %v1324_v31  ;;  %1554 = vst [vmem:[%s2571_s8 + $0x468] sm:$0xff] %v1069_v32  ;;  %v1326_v33 = vpop.f32.mrb[99].mxu1 }
 0x1ba   : > { %1556 = vst [vmem:[%s2571_s8 + $0x478] sm:$0xff] %v1326_v33 }
 0x1bb   : > { %v1073_v34 = vpop.f32.mrb[100].mxu0 }
 0x1bc   : > { %1561 = vst [vmem:[%s2571_s8 + $0x4a0] sm:$0xff] %v1073_v34  ;;  %v1330_v35 = vpop.f32.mrb[100].mxu1  ;;  %v1075_v36 = vpop.f32.mrb[101].mxu0 }
 0x1bd   : > { %1563 = vst [vmem:[%s2571_s8 + $0x4b0] sm:$0xff] %v1330_v35  ;;  %1562 = vst [vmem:[%s2571_s8 + $0x4a8] sm:$0xff] %v1075_v36  ;;  %v1332_v37 = vpop.f32.mrb[101].mxu1 }
 0x1be   : > { %1564 = vst [vmem:[%s2571_s8 + $0x4b8] sm:$0xff] %v1332_v37 }
 0x1bf   : > { %v1079_v38 = vpop.f32.mrb[102].mxu0 }
 0x1c0   : > { %1569 = vst [vmem:[%s2571_s8 + $0x4e0] sm:$0xff] %v1079_v38  ;;  %v1336_v39 = vpop.f32.mrb[102].mxu1  ;;  %v1081_v40 = vpop.f32.mrb[103].mxu0 }
 0x1c1   : > { %1571 = vst [vmem:[%s2571_s8 + $0x4f0] sm:$0xff] %v1336_v39  ;;  %1570 = vst [vmem:[%s2571_s8 + $0x4e8] sm:$0xff] %v1081_v40  ;;  %v1338_v41 = vpop.f32.mrb[103].mxu1 }
 0x1c2   : > { %1572 = vst [vmem:[%s2571_s8 + $0x4f8] sm:$0xff] %v1338_v41 }
 0x1c3   : > { %v1085_v42 = vpop.f32.mrb[104].mxu0 }
 0x1c4   : > { %1577 = vst [vmem:[%s2571_s8 + $0x520] sm:$0xff] %v1085_v42  ;;  %v1342_v43 = vpop.f32.mrb[104].mxu1  ;;  %v1087_v44 = vpop.f32.mrb[105].mxu0 }
 0x1c5   : > { %1579 = vst [vmem:[%s2571_s8 + $0x530] sm:$0xff] %v1342_v43  ;;  %1578 = vst [vmem:[%s2571_s8 + $0x528] sm:$0xff] %v1087_v44  ;;  %v1344_v45 = vpop.f32.mrb[105].mxu1 }
 0x1c6   : > { %1580 = vst [vmem:[%s2571_s8 + $0x538] sm:$0xff] %v1344_v45 }
 0x1c7   : > { %v1091_v46 = vpop.f32.mrb[106].mxu0 }
 0x1c8   : > { %1585 = vst [vmem:[%s2571_s8 + $0x560] sm:$0xff] %v1091_v46  ;;  %v1348_v47 = vpop.f32.mrb[106].mxu1  ;;  %v1093_v48 = vpop.f32.mrb[107].mxu0 }
 0x1c9   : > { %1587 = vst [vmem:[%s2571_s8 + $0x570] sm:$0xff] %v1348_v47  ;;  %1586 = vst [vmem:[%s2571_s8 + $0x568] sm:$0xff] %v1093_v48  ;;  %v1350_v49 = vpop.f32.mrb[107].mxu1 }
 0x1ca   : > { %1588 = vst [vmem:[%s2571_s8 + $0x578] sm:$0xff] %v1350_v49 }
 0x1cb   : > { %v1097_v50 = vpop.f32.mrb[108].mxu0 }
 0x1cc   : > { %1593 = vst [vmem:[%s2571_s8 + $0x5a0] sm:$0xff] %v1097_v50  ;;  %v1354_v51 = vpop.f32.mrb[108].mxu1  ;;  %v1099_v52 = vpop.f32.mrb[109].mxu0 }
 0x1cd   : > { %1595 = vst [vmem:[%s2571_s8 + $0x5b0] sm:$0xff] %v1354_v51  ;;  %1594 = vst [vmem:[%s2571_s8 + $0x5a8] sm:$0xff] %v1099_v52  ;;  %v1356_v53 = vpop.f32.mrb[109].mxu1 }
 0x1ce   : > { %1596 = vst [vmem:[%s2571_s8 + $0x5b8] sm:$0xff] %v1356_v53 }
 0x1cf   : > { %v1103_v54 = vpop.f32.mrb[110].mxu0 }
 0x1d0   : > { %1601 = vst [vmem:[%s2571_s8 + $0x5e0] sm:$0xff] %v1103_v54  ;;  %v1360_v55 = vpop.f32.mrb[110].mxu1  ;;  %v1105_v56 = vpop.f32.mrb[111].mxu0 }
 0x1d1   : > { %1603 = vst [vmem:[%s2571_s8 + $0x5f0] sm:$0xff] %v1360_v55  ;;  %1602 = vst [vmem:[%s2571_s8 + $0x5e8] sm:$0xff] %v1105_v56  ;;  %v1362_v57 = vpop.f32.mrb[111].mxu1 }
 0x1d2   : > { %1604 = vst [vmem:[%s2571_s8 + $0x5f8] sm:$0xff] %v1362_v57 }
 0x1d3   : > { %v1109_v58 = vpop.f32.mrb[112].mxu0 }
 0x1d4   : > { %1609 = vst [vmem:[%s2571_s8 + $0x620] sm:$0xff] %v1109_v58  ;;  %v1366_v59 = vpop.f32.mrb[112].mxu1  ;;  %v1111_v60 = vpop.f32.mrb[113].mxu0 }
 0x1d5   : > { %1611 = vst [vmem:[%s2571_s8 + $0x630] sm:$0xff] %v1366_v59  ;;  %1610 = vst [vmem:[%s2571_s8 + $0x628] sm:$0xff] %v1111_v60  ;;  %v1368_v61 = vpop.f32.mrb[113].mxu1 }
 0x1d6   : > { %1612 = vst [vmem:[%s2571_s8 + $0x638] sm:$0xff] %v1368_v61 }
 0x1d7   : > { %v1115_v62 = vpop.f32.mrb[114].mxu0 }
 0x1d8   : > { %1617 = vst [vmem:[%s2571_s8 + $0x660] sm:$0xff] %v1115_v62  ;;  %v1372_v63 = vpop.f32.mrb[114].mxu1  ;;  %v1117_v1 = vpop.f32.mrb[115].mxu0 }
 0x1d9   : > { %1619 = vst [vmem:[%s2571_s8 + $0x670] sm:$0xff] %v1372_v63  ;;  %1618 = vst [vmem:[%s2571_s8 + $0x668] sm:$0xff] %v1117_v1  ;;  %v1374_v2 = vpop.f32.mrb[115].mxu1 }
 0x1da   : > { %1620 = vst [vmem:[%s2571_s8 + $0x678] sm:$0xff] %v1374_v2 }
 0x1db   : > { %v1121_v3 = vpop.f32.mrb[116].mxu0 }
 0x1dc   : > { %1625 = vst [vmem:[%s2571_s8 + $0x6a0] sm:$0xff] %v1121_v3  ;;  %v1378_v4 = vpop.f32.mrb[116].mxu1  ;;  %v1123_v5 = vpop.f32.mrb[117].mxu0 }
 0x1dd   : > { %1627 = vst [vmem:[%s2571_s8 + $0x6b0] sm:$0xff] %v1378_v4  ;;  %1626 = vst [vmem:[%s2571_s8 + $0x6a8] sm:$0xff] %v1123_v5  ;;  %v1380_v6 = vpop.f32.mrb[117].mxu1 }
 0x1de   : > { %1628 = vst [vmem:[%s2571_s8 + $0x6b8] sm:$0xff] %v1380_v6 }
 0x1df   : > { %v1127_v0 = vpop.f32.mrb[118].mxu0 }
 0x1e0   : > { %1633 = vst [vmem:[%s2571_s8 + $0x6e0] sm:$0xff] %v1127_v0  ;;  %v1384_v7 = vpop.f32.mrb[118].mxu1  ;;  %v1129_v8 = vpop.f32.mrb[119].mxu0 }
 0x1e1   : > { %1635 = vst [vmem:[%s2571_s8 + $0x6f0] sm:$0xff] %v1384_v7  ;;  %1634 = vst [vmem:[%s2571_s8 + $0x6e8] sm:$0xff] %v1129_v8  ;;  %v1386_v9 = vpop.f32.mrb[119].mxu1 }
 0x1e2   : > { %1636 = vst [vmem:[%s2571_s8 + $0x6f8] sm:$0xff] %v1386_v9 }
 0x1e3   : > { %v1133_v10 = vpop.f32.mrb[120].mxu0 }
 0x1e4   : > { %1641 = vst [vmem:[%s2571_s8 + $0x720] sm:$0xff] %v1133_v10  ;;  %v1390_v11 = vpop.f32.mrb[120].mxu1  ;;  %v1135_v12 = vpop.f32.mrb[121].mxu0 }
 0x1e5   : > { %1643 = vst [vmem:[%s2571_s8 + $0x730] sm:$0xff] %v1390_v11  ;;  %1642 = vst [vmem:[%s2571_s8 + $0x728] sm:$0xff] %v1135_v12  ;;  %v1392_v13 = vpop.f32.mrb[121].mxu1 }
 0x1e6   : > { %1644 = vst [vmem:[%s2571_s8 + $0x738] sm:$0xff] %v1392_v13 }
 0x1e7   : > { %v1139_v14 = vpop.f32.mrb[122].mxu0 }
 0x1e8   : > { %1649 = vst [vmem:[%s2571_s8 + $0x760] sm:$0xff] %v1139_v14  ;;  %v1396_v15 = vpop.f32.mrb[122].mxu1  ;;  %v1141_v16 = vpop.f32.mrb[123].mxu0 }
 0x1e9   : > { %1651 = vst [vmem:[%s2571_s8 + $0x770] sm:$0xff] %v1396_v15  ;;  %1650 = vst [vmem:[%s2571_s8 + $0x768] sm:$0xff] %v1141_v16  ;;  %v1398_v17 = vpop.f32.mrb[123].mxu1 }
 0x1ea   : > { %1652 = vst [vmem:[%s2571_s8 + $0x778] sm:$0xff] %v1398_v17 }
 0x1eb   : > { %v1145_v18 = vpop.f32.mrb[124].mxu0 }
 0x1ec   : > { %1657 = vst [vmem:[%s2571_s8 + $0x7a0] sm:$0xff] %v1145_v18  ;;  %v1402_v19 = vpop.f32.mrb[124].mxu1  ;;  %v1147_v20 = vpop.f32.mrb[125].mxu0 }
 0x1ed   : > { %1659 = vst [vmem:[%s2571_s8 + $0x7b0] sm:$0xff] %v1402_v19  ;;  %1658 = vst [vmem:[%s2571_s8 + $0x7a8] sm:$0xff] %v1147_v20  ;;  %v1404_v21 = vpop.f32.mrb[125].mxu1 }
 0x1ee   : > { %1660 = vst [vmem:[%s2571_s8 + $0x7b8] sm:$0xff] %v1404_v21 }
 0x1ef   : > { %v1151_v22 = vpop.f32.mrb[126].mxu0 }
 0x1f0   : > { %1665 = vst [vmem:[%s2571_s8 + $0x7e0] sm:$0xff] %v1151_v22  ;;  %v1408_v23 = vpop.f32.mrb[126].mxu1  ;;  %v1153_v24 = vpop.f32.mrb[127].mxu0 }
 0x1f1   : > { %1667 = vst [vmem:[%s2571_s8 + $0x7f0] sm:$0xff] %v1408_v23  ;;  %1666 = vst [vmem:[%s2571_s8 + $0x7e8] sm:$0xff] %v1153_v24  ;;  %v1410_v25 = vpop.f32.mrb[127].mxu1 }
 0x1f2   : > { %1668 = vst [vmem:[%s2571_s8 + $0x7f8] sm:$0xff] %v1410_v25 }
 0x1f3 PF: > { %s12_s11 = sadd.s32 1, %s1999_s11   ;;  %s2909_s9 = smov %s1995_s10 }
 0x1f4   : > { %p9_p5 = scmp.ge.s32.totalorder %s12_s11, 4   ;;  %s2910_s10 = smov %s2912_s12 }
 0x1f6   :  { %11 = sbr.rel (!%p9_p5) target bundleno = 2 (0x2), region = 61 }

</bundles_post_ra>
